<compile_context>
chip_gen: v7x
topology: tpu7x:2x2x1
jax: 0.10.0
libtpu: 0.0.40
codegen_flags: <defaults>
</compile_context>

<pallas_src>
import functools

import jax
import jax.numpy as jnp
import numpy as np
from jax.experimental import pallas as pl
from jax.experimental.pallas import tpu as pltpu

# clamp constants copied verbatim from the PyTorch script
CLAMP_MIN = 0.98   # passed as `min` to clamp_min
CLAMP_MAX = 0.02   # passed as `max` to clamp_max


def _conv_clamp_kernel(x_ref, w_ref, b_ref, o_ref, *, H, W, clamp_lo, clamp_hi):
    # x_ref: (1, H+2, W+2, Cp_in)        padded input, one image, one group-block
    # w_ref: (1, 9*Cp_in, Cp_out)        block-diagonal weights, taps stacked on K
    # b_ref: (1, 1, Cp_out)
    # o_ref: (1, H, W, Cp_out)
    cin = x_ref.shape[-1]
    # im2col in VMEM: 9 shifted windows concatenated along the lane (channel)
    # axis -> one big K dimension -> a single MXU matmul.
    cols = [x_ref[0, kh:kh + H, kw:kw + W, :] for kh in range(3) for kw in range(3)]
    patches = jnp.concatenate(cols, axis=-1).reshape(H * W, 9 * cin)
    acc = jnp.dot(patches, w_ref[0], preferred_element_type=jnp.float32)
    acc = acc + b_ref[0]                              # (H*W, Cp_out) + (1, Cp_out)
    # torch.clamp_min then torch.clamp_max (exact order)
    acc = jnp.minimum(jnp.maximum(acc, clamp_lo), clamp_hi)
    o_ref[0] = acc.reshape(H, W, -1).astype(o_ref.dtype)


def grouped_conv_clamp(x_nchw, weight, bias, *, groups, clamp_lo, clamp_hi):
    """x_nchw: (N, Cin, H, W); weight: (Cout, Cin//groups, 3, 3); bias: (Cout,).
    Returns (N, Cout, H, W) = clamp_max(clamp_min(conv2d(x), lo), hi)."""
    N, Cin, H, W = x_nchw.shape
    Cout = weight.shape[0]
    Cin_g = Cin // groups
    Cout_g = Cout // groups
    Hp, Wp = H + 2, W + 2

    # ---- choose how many groups to pack per block (lane density >= 128) ----
    gpb = groups
    for d in range(1, groups + 1):
        if groups % d == 0 and d * Cout_g >= 128 and d * Cin_g >= 128:
            gpb = d
            break
    GB = groups // gpb
    Cpi, Cpo = gpb * Cin_g, gpb * Cout_g
    if GB > 1 and (Cpi % 128 != 0 or Cpo % 128 != 0):
        # fall back to a single block so BlockSpec lane tiling stays legal
        gpb, GB = groups, 1
        Cpi, Cpo = gpb * Cin_g, gpb * Cout_g

    # ---- single activation relayout pass: NCHW -> padded NHWC (group-major C) ----
    x = jnp.transpose(x_nchw, (0, 2, 3, 1))                   # (N, H, W, Cin)
    x = jnp.pad(x, ((0, 0), (1, 1), (1, 1), (0, 0)))          # (N, Hp, Wp, Cin)

    # ---- weights: block-diagonal within each group-block, taps folded into K ----
    # PyTorch layout: weight[o, ci, kh, kw], o group-major.
    w = weight.reshape(GB, gpb, Cout_g, Cin_g, 3, 3)          # [gb, g, co, ci, kh, kw]
    w = jnp.transpose(w, (0, 4, 5, 1, 3, 2))                  # [gb, kh, kw, g, ci, co]
    eye = jnp.eye(gpb, dtype=w.dtype)                         # [gi, go]
    w_bd = w[:, :, :, :, :, None, :] * eye[None, None, None, :, None, :, None]
    # [gb, kh, kw, gi, ci, go, co] -> (GB, 9*Cpi, Cpo); rows = (kh*3+kw)*Cpi + gi*Cin_g + ci
    w_bd = w_bd.reshape(GB, 9 * Cpi, Cpo)

    b = bias.reshape(GB, 1, Cpo)

    kernel = functools.partial(_conv_clamp_kernel, H=H, W=W,
                               clamp_lo=clamp_lo, clamp_hi=clamp_hi)

    out = pl.pallas_call(
        kernel,
        out_shape=jax.ShapeDtypeStruct((N, H, W, Cout), x_nchw.dtype),
        grid_spec=pl.GridSpec(
            # gb is the slow axis, n the fast axis -> the weight/bias block
            # index is constant across consecutive steps (stays resident).
            grid=(GB, N),
            in_specs=[
                pl.BlockSpec((1, Hp, Wp, Cpi), lambda gb, n: (n, 0, 0, gb)),
                pl.BlockSpec((1, 9 * Cpi, Cpo), lambda gb, n: (gb, 0, 0)),
                pl.BlockSpec((1, 1, Cpo), lambda gb, n: (gb, 0, 0)),
            ],
            out_specs=pl.BlockSpec((1, H, W, Cpo), lambda gb, n: (n, 0, 0, gb)),
        ),
        compiler_params=pltpu.CompilerParams(
            dimension_semantics=("parallel", "parallel")),
    )(x, w_bd, b)

    # NHWC (group-major channels == PyTorch channel order) -> NCHW
    return jnp.transpose(out, (0, 3, 1, 2))


def _reference(x_nchw, weight, bias, groups, clamp_lo, clamp_hi):
    y = jax.lax.conv_general_dilated(
        x_nchw, weight, window_strides=(1, 1), padding=((1, 1), (1, 1)),
        dimension_numbers=("NCHW", "OIHW", "NCHW"),
        feature_group_count=groups,
        precision=jax.lax.Precision.HIGHEST)
    y = y + bias[None, :, None, None]
    y = jnp.maximum(y, clamp_lo)
    y = jnp.minimum(y, clamp_hi)
    return y


if __name__ == "__main__":
    # Small, valid shapes consistent with the module's structure
    # (grouped 3x3 conv, stride 1, pad 1), chosen so packed lane dims hit 128.
    N, Cin, H, W = 2, 256, 16, 16
    Cout, groups = 256, 8

    key = jax.random.PRNGKey(0)
    kx, kw, kb = jax.random.split(key, 3)
    x = jax.random.normal(kx, (N, Cin, H, W), dtype=jnp.float32)
    weight = jax.random.normal(kw, (Cout, Cin // groups, 3, 3), dtype=jnp.float32) * 0.1
    bias = jax.random.normal(kb, (Cout,), dtype=jnp.float32) * 0.1

    # Faithful module semantics: clamp_min(0.98) then clamp_max(0.02).
    conv_fn = jax.jit(functools.partial(grouped_conv_clamp, groups=groups,
                                        clamp_lo=CLAMP_MIN, clamp_hi=CLAMP_MAX))
    out = jax.block_until_ready(conv_fn(x, weight, bias))
    ref = _reference(x, weight, bias, groups, CLAMP_MIN, CLAMP_MAX)
    np.testing.assert_allclose(np.asarray(out), np.asarray(ref), rtol=1e-5, atol=1e-6)

    # Sanity check of the conv path itself with wide clamp bounds (the faithful
    # bounds collapse every output to 0.02 and would hide layout bugs).
    conv_wide = jax.jit(functools.partial(grouped_conv_clamp, groups=groups,
                                          clamp_lo=-1e30, clamp_hi=1e30))
    out_w = jax.block_until_ready(conv_wide(x, weight, bias))
    ref_w = _reference(x, weight, bias, groups, -1e30, 1e30)
    np.testing.assert_allclose(np.asarray(out_w), np.asarray(ref_w),
                               rtol=1e-3, atol=1e-3)

    print("KERNEL_OK")
</pallas_src>

<mosaic_0001>
module attributes {stable_mosaic.version = 11 : i64} {
  func.func @_conv_clamp_kernel(%arg0: i32, %arg1: i32, %arg2: memref<1x18x18x128xf32, #tpu.memory_space<vmem>>, %arg3: memref<1x1152x128xf32, #tpu.memory_space<vmem>>, %arg4: memref<1x1x128xf32, #tpu.memory_space<vmem>>, %arg5: memref<1x16x16x128xf32, #tpu.memory_space<vmem>>) attributes {dimension_semantics = [#tpu.dimension_semantics<parallel>, #tpu.dimension_semantics<parallel>], iteration_bounds = array<i64: 2, 2>, scalar_prefetch = 0 : i64, scratch_operands = 0 : i64, tpu.core_type = #tpu.core_type<tc>, window_params = [{transform_indices = @transform_0, window_bounds = array<i64: 1, 18, 18, 128>}, {transform_indices = @transform_1, window_bounds = array<i64: 1, 1152, 128>}, {transform_indices = @transform_2, window_bounds = array<i64: 1, 1, 128>}, {transform_indices = @transform_3, window_bounds = array<i64: 1, 16, 16, 128>}]} {
    %c0 = arith.constant 0 : index
    %c0_0 = arith.constant 0 : index
    %c0_1 = arith.constant 0 : index
    %c0_2 = arith.constant 0 : index
    %0 = vector.load %arg2[%c0, %c0_0, %c0_1, %c0_2] : memref<1x18x18x128xf32, #tpu.memory_space<vmem>>, vector<1x16x16x128xf32>
    %1 = vector.shape_cast %0 : vector<1x16x16x128xf32> to vector<16x16x128xf32>
    %c0_3 = arith.constant 0 : index
    %c0_4 = arith.constant 0 : index
    %c1 = arith.constant 1 : index
    %c0_5 = arith.constant 0 : index
    %2 = vector.load %arg2[%c0_3, %c0_4, %c1, %c0_5] : memref<1x18x18x128xf32, #tpu.memory_space<vmem>>, vector<1x16x16x128xf32>
    %3 = vector.shape_cast %2 : vector<1x16x16x128xf32> to vector<16x16x128xf32>
    %c0_6 = arith.constant 0 : index
    %c0_7 = arith.constant 0 : index
    %c2 = arith.constant 2 : index
    %c0_8 = arith.constant 0 : index
    %4 = vector.load %arg2[%c0_6, %c0_7, %c2, %c0_8] : memref<1x18x18x128xf32, #tpu.memory_space<vmem>>, vector<1x16x16x128xf32>
    %5 = vector.shape_cast %4 : vector<1x16x16x128xf32> to vector<16x16x128xf32>
    %c0_9 = arith.constant 0 : index
    %c1_10 = arith.constant 1 : index
    %c0_11 = arith.constant 0 : index
    %c0_12 = arith.constant 0 : index
    %6 = vector.load %arg2[%c0_9, %c1_10, %c0_11, %c0_12] : memref<1x18x18x128xf32, #tpu.memory_space<vmem>>, vector<1x16x16x128xf32>
    %7 = vector.shape_cast %6 : vector<1x16x16x128xf32> to vector<16x16x128xf32>
    %c0_13 = arith.constant 0 : index
    %c1_14 = arith.constant 1 : index
    %c1_15 = arith.constant 1 : index
    %c0_16 = arith.constant 0 : index
    %8 = vector.load %arg2[%c0_13, %c1_14, %c1_15, %c0_16] : memref<1x18x18x128xf32, #tpu.memory_space<vmem>>, vector<1x16x16x128xf32>
    %9 = vector.shape_cast %8 : vector<1x16x16x128xf32> to vector<16x16x128xf32>
    %c0_17 = arith.constant 0 : index
    %c1_18 = arith.constant 1 : index
    %c2_19 = arith.constant 2 : index
    %c0_20 = arith.constant 0 : index
    %10 = vector.load %arg2[%c0_17, %c1_18, %c2_19, %c0_20] : memref<1x18x18x128xf32, #tpu.memory_space<vmem>>, vector<1x16x16x128xf32>
    %11 = vector.shape_cast %10 : vector<1x16x16x128xf32> to vector<16x16x128xf32>
    %c0_21 = arith.constant 0 : index
    %c2_22 = arith.constant 2 : index
    %c0_23 = arith.constant 0 : index
    %c0_24 = arith.constant 0 : index
    %12 = vector.load %arg2[%c0_21, %c2_22, %c0_23, %c0_24] : memref<1x18x18x128xf32, #tpu.memory_space<vmem>>, vector<1x16x16x128xf32>
    %13 = vector.shape_cast %12 : vector<1x16x16x128xf32> to vector<16x16x128xf32>
    %c0_25 = arith.constant 0 : index
    %c2_26 = arith.constant 2 : index
    %c1_27 = arith.constant 1 : index
    %c0_28 = arith.constant 0 : index
    %14 = vector.load %arg2[%c0_25, %c2_26, %c1_27, %c0_28] : memref<1x18x18x128xf32, #tpu.memory_space<vmem>>, vector<1x16x16x128xf32>
    %15 = vector.shape_cast %14 : vector<1x16x16x128xf32> to vector<16x16x128xf32>
    %c0_29 = arith.constant 0 : index
    %c2_30 = arith.constant 2 : index
    %c2_31 = arith.constant 2 : index
    %c0_32 = arith.constant 0 : index
    %16 = vector.load %arg2[%c0_29, %c2_30, %c2_31, %c0_32] : memref<1x18x18x128xf32, #tpu.memory_space<vmem>>, vector<1x16x16x128xf32>
    %17 = vector.shape_cast %16 : vector<1x16x16x128xf32> to vector<16x16x128xf32>
    %18 = tpu.concatenate %1, %3, %5, %7, %9, %11, %13, %15, %17 in 2 : vector<16x16x128xf32>, vector<16x16x128xf32>, vector<16x16x128xf32>, vector<16x16x128xf32>, vector<16x16x128xf32>, vector<16x16x128xf32>, vector<16x16x128xf32>, vector<16x16x128xf32>, vector<16x16x128xf32> -> vector<16x16x1152xf32>
    %19 = vector.shape_cast %18 : vector<16x16x1152xf32> to vector<256x1152xf32>
    %c0_33 = arith.constant 0 : index
    %c0_34 = arith.constant 0 : index
    %c0_35 = arith.constant 0 : index
    %20 = vector.load %arg3[%c0_33, %c0_34, %c0_35] : memref<1x1152x128xf32, #tpu.memory_space<vmem>>, vector<1x1152x128xf32>
    %21 = vector.shape_cast %20 : vector<1x1152x128xf32> to vector<1152x128xf32>
    %cst = arith.constant dense<0.000000e+00> : vector<256x128xf32>
    %22 = tpu.matmul %19, %21, %cst {dimension_numbers = #tpu.dot_dimension_numbers<[1], [0], [0], [1], [0, 0, 1, 1], [], []>} : vector<256x1152xf32>, vector<1152x128xf32>, vector<256x128xf32> -> vector<256x128xf32>
    %c0_36 = arith.constant 0 : index
    %c0_37 = arith.constant 0 : index
    %c0_38 = arith.constant 0 : index
    %23 = vector.load %arg4[%c0_36, %c0_37, %c0_38] : memref<1x1x128xf32, #tpu.memory_space<vmem>>, vector<1x1x128xf32>
    %24 = vector.shape_cast %23 : vector<1x1x128xf32> to vector<1x128xf32>
    %25 = vector.broadcast %24 : vector<1x128xf32> to vector<256x128xf32>
    %26 = arith.addf %22, %25 : vector<256x128xf32>
    %cst_39 = arith.constant 9.800000e-01 : f32
    %27 = vector.broadcast %cst_39 : f32 to vector<256x128xf32>
    %28 = arith.maximumf %26, %27 : vector<256x128xf32>
    %cst_40 = arith.constant 2.000000e-02 : f32
    %29 = vector.broadcast %cst_40 : f32 to vector<256x128xf32>
    %30 = arith.minimumf %28, %29 : vector<256x128xf32>
    %31 = vector.shape_cast %30 : vector<256x128xf32> to vector<16x16x128xf32>
    %c0_41 = arith.constant 0 : index
    %c0_42 = arith.constant 0 : index
    %c0_43 = arith.constant 0 : index
    %c0_44 = arith.constant 0 : index
    %32 = vector.load %arg5[%c0_41, %c0_42, %c0_43, %c0_44] : memref<1x16x16x128xf32, #tpu.memory_space<vmem>>, vector<1x16x16x128xf32>
    %33 = vector.shape_cast %32 : vector<1x16x16x128xf32> to vector<16x16x128xf32>
    %34 = vector.shape_cast %31 : vector<16x16x128xf32> to vector<1x16x16x128xf32>
    tpu.vector_store %arg5[%c0_41, %c0_42, %c0_43, %c0_44], %34 {strides = array<i32>} : memref<1x16x16x128xf32, #tpu.memory_space<vmem>>, vector<1x16x16x128xf32>,
    return
  }
  func.func @transform_0(%arg0: i32, %arg1: i32) -> (i32, i32, i32, i32) {
    %c0_i32 = arith.constant 0 : i32
    %c0_i32_0 = arith.constant 0 : i32
    %c0_i32_1 = arith.constant 0 : i32
    return %arg1, %c0_i32, %c0_i32_0, %arg0 : i32, i32, i32, i32
  }
  func.func @transform_1(%arg0: i32, %arg1: i32) -> (i32, i32, i32) {
    %c0_i32 = arith.constant 0 : i32
    %c0_i32_0 = arith.constant 0 : i32
    %c0_i32_1 = arith.constant 0 : i32
    return %arg0, %c0_i32, %c0_i32_0 : i32, i32, i32
  }
  func.func @transform_2(%arg0: i32, %arg1: i32) -> (i32, i32, i32) {
    %c0_i32 = arith.constant 0 : i32
    %c0_i32_0 = arith.constant 0 : i32
    %c0_i32_1 = arith.constant 0 : i32
    return %arg0, %c0_i32, %c0_i32_0 : i32, i32, i32
  }
  func.func @transform_3(%arg0: i32, %arg1: i32) -> (i32, i32, i32, i32) {
    %c0_i32 = arith.constant 0 : i32
    %c0_i32_0 = arith.constant 0 : i32
    %c0_i32_1 = arith.constant 0 : i32
    return %arg1, %c0_i32, %c0_i32_0, %arg0 : i32, i32, i32, i32
  }
}

</mosaic_0001>

<bundles_post_ra>
// kernel: grouped_conv_clamp.1
= control target key start
LH: loop header
LB: loop body
LE: loop exit
PB: predicated region body
PF: predicated region fallthrough
CT: control target
= control target key end

     0   :  { %8 = vsyncpa [#allocation4], 0  ;;  %s4626_s0 = inlined_call_operand.vmem [shape: f32[2,18,18,256], index: 0, kind: input, shape index: {}]   ;;  %s4627_s1 = inlined_call_operand.vmem [shape: f32[2,1152,128], index: 1, kind: input, shape index: {}]   ;;  %s4628_s2 = inlined_call_operand.vmem [shape: f32[2,1,128], index: 2, kind: input, shape index: {}]   ;;  %s4629_s3 = inlined_call_operand.hbm [shape: f32[2,16,16,256], index: 3, kind: output, shape index: {}]  }
   0x1   :  { %10 = vsyncpa [#allocation4 + $0x1], 0  ;;  %s3206_s12 = smov 0   ;;  %s3208_s13 = smov 0  }
   0x2   :  { %s3210_s14 = smov 0   ;;  %s3212_s15 = smov 0  }
   0x3   :  { %s3214_s16 = smov 0   ;;  %s3216_s17 = smov 0  }
   0x4   :  { %s3218_s18 = smov 0   ;;  %s3220_s19 = smov 0  }
   0x5 LB: > { %s2248_s20 = sadd.s32 4294967295, %s3179_s19   ;;  %s2249_s21 = sadd.s32 4294967294, %s3179_s19   ;;  %s3179_s19 = sphi %s3220_s19, %s16_s19   ;;  %s3175_s18 = sphi %s3218_s18, %s4784_s18   ;;  %s3171_s17 = sphi %s3216_s17, %s4783_s17   ;;  %s3167_s16 = sphi %s3214_s16, %s4782_s16   ;;  %s3163_s15 = sphi %s3212_s15, %s4781_s15   ;;  %s3159_s14 = sphi %s3210_s14, %s4780_s14   ;;  %s3155_s13 = sphi %s3208_s13, %s4779_s13   ;;  %s3151_s12 = sphi %s3206_s12, %s4778_s12  }
   0x6   : > { %s25_s22 = sadd.s32 1, %s3171_s17  ;;  %s28_s23 = sadd.s32 1, %s3175_s18 }
   0x7   : > { %p26_p0 = scmp.ge.s32.totalorder %s25_s22, 2  ;;  %p44_p1 = scmp.ne.s32.totalorder %s3159_s14, %s3155_s13 }
   0x8   : > { %p45_p2 = scmp.eq.s32.totalorder %s3179_s19, 0  ;;  %p128_p5 = scmp.eq.s32.totalorder %s2248_s20, 3 }
   0x9   : > { %s4786_s22 = smov (%p26_p0, %s25_s22), 0  ;;  %s4788_s23 = smov (!%p26_p0, %s28_s23), %s3175_s18 }
   0xa   : > { %s32_s24 = ssub.s32 %s3171_s17, %s4786_s22  ;;  %p3258_p3 = por %p45_p2, %p44_p1 }
   0xb   : > { %p30_p4 = scmp.ge.s32.totalorder %s4788_s23, 2  ;;  %p133_p6 = scmp.ne.s32.totalorder %s3155_s13, %s3151_s12 }
   0xc   : > { %p134_p7 = scmp.eq.s32.totalorder %s2249_s21, 3  ;;  %p3266_p8 = por %p128_p5, %p44_p1 }
   0xd   : > { %s4790_s23 = smov (%p30_p4, %s4788_s23), 0  ;;  %s37_s30 = sadd.s32 1, %s3159_s14 }
   0xe   : > { %p3270_p9 = por %p134_p7, %p133_p6  ;;  %s33_s28 = ssub.s32 %s3175_s18, %s4790_s23 }
   0xf   : > { %s34_s29 = sor.u32 %s33_s28, %s32_s24  ;;  %p2251_p11 = scmp.ge.s32.totalorder %s3179_s19, 4 }
  0x10   : > { %p35_p10 = scmp.eq.s32.totalorder %s34_s29, 0 }
  0x11   : > { %150 = sbr.rel (%p2251_p11) target bundleno = 58 (0x3a), region = 16 }
  0x12   : > { %s3278_s4 = scalar_select %p35_p10, %s3159_s14, %s37_s30  }
  0x18   : > { %153 = sbr.rel (!%p3258_p3) target bundleno = 58 (0x3a), region = 20  ;;  %s155_s5 = sand.u32 (%p3258_p3), 1, %s3159_s14  }
  0x19   : > { %s3007_s6 = smul.u32 (%p3258_p3), 108, %s3171_s17 }
  0x1a   : > { %s3006_s7 = smul.u32 (%p3258_p3), 432, %s155_s5 }
  0x1b   : > { %s159_s8 = sadd.s32 (%p3258_p3), %s3175_s18, %s3007_s6 }
  0x1c   : > { %s2252_s9 = sshll.u32 (%p3258_p3), %s159_s8, 3  ;;  %s3294_s21 = scalar_lea.vmem (%p3258_p3), [#allocation2], %s3006_s7 }
  0x1d   : > { %s3289_s20 = scalar_lea.vmem (%p3258_p3), %s4626_s0, %s2252_s9 }
  0x1e   : > { %v295_v0 = vld [vmem:[%s3289_s20] sm:$0xff] (%p3258_p3)  ;;  %v297_v1 = vld [vmem:[%s3289_s20 + $0x10] sm:$0xff] (%p3258_p3) }
  0x1f   : > { %v299_v2 = vld [vmem:[%s3289_s20 + $0x20] sm:$0xff]  ;;  %296 = vst [vmem:[%s3294_s21] sm:$0xff] %v295_v0  ;;  %298 = vst [vmem:[%s3294_s21 + $0x8] sm:$0xff] %v297_v1  ;;  %v301_v3 = vld [vmem:[%s3289_s20 + $0x30] sm:$0xff] }
  0x20   : > { %300 = vst [vmem:[%s3294_s21 + $0x10] sm:$0xff] %v299_v2  ;;  %v303_v4 = vld [vmem:[%s3289_s20 + $0x40] sm:$0xff]  ;;  %v305_v5 = vld [vmem:[%s3289_s20 + $0x50] sm:$0xff]  ;;  %302 = vst [vmem:[%s3294_s21 + $0x18] sm:$0xff] %v301_v3 }
  0x21   : > { %304 = vst [vmem:[%s3294_s21 + $0x20] sm:$0xff] %v303_v4  ;;  %306 = vst [vmem:[%s3294_s21 + $0x28] sm:$0xff] %v305_v5  ;;  %v307_v6 = vld [vmem:[%s3289_s20 + $0x60] sm:$0xff]  ;;  %v309_v7 = vld [vmem:[%s3289_s20 + $0x70] sm:$0xff] }
  0x22   : > { %v311_v8 = vld [vmem:[%s3289_s20 + $0x80] sm:$0xff]  ;;  %308 = vst [vmem:[%s3294_s21 + $0x30] sm:$0xff] %v307_v6  ;;  %310 = vst [vmem:[%s3294_s21 + $0x38] sm:$0xff] %v309_v7  ;;  %v313_v9 = vld [vmem:[%s3289_s20 + $0x90] sm:$0xff] }
  0x23   : > { %312 = vst [vmem:[%s3294_s21 + $0x40] sm:$0xff] %v311_v8  ;;  %v315_v10 = vld [vmem:[%s3289_s20 + $0xa0] sm:$0xff]  ;;  %v317_v11 = vld [vmem:[%s3289_s20 + $0xb0] sm:$0xff]  ;;  %314 = vst [vmem:[%s3294_s21 + $0x48] sm:$0xff] %v313_v9 }
  0x24   : > { %316 = vst [vmem:[%s3294_s21 + $0x50] sm:$0xff] %v315_v10  ;;  %318 = vst [vmem:[%s3294_s21 + $0x58] sm:$0xff] %v317_v11  ;;  %v319_v12 = vld [vmem:[%s3289_s20 + $0xc0] sm:$0xff]  ;;  %v321_v13 = vld [vmem:[%s3289_s20 + $0xd0] sm:$0xff] }
  0x25   : > { %v323_v14 = vld [vmem:[%s3289_s20 + $0xe0] sm:$0xff]  ;;  %320 = vst [vmem:[%s3294_s21 + $0x60] sm:$0xff] %v319_v12  ;;  %322 = vst [vmem:[%s3294_s21 + $0x68] sm:$0xff] %v321_v13  ;;  %v325_v15 = vld [vmem:[%s3289_s20 + $0xf0] sm:$0xff] }
  0x26   : > { %324 = vst [vmem:[%s3294_s21 + $0x70] sm:$0xff] %v323_v14  ;;  %v327_v16 = vld [vmem:[%s3289_s20 + $0x100] sm:$0xff]  ;;  %v329_v17 = vld [vmem:[%s3289_s20 + $0x110] sm:$0xff]  ;;  %326 = vst [vmem:[%s3294_s21 + $0x78] sm:$0xff] %v325_v15 }
  0x27   : > { %328 = vst [vmem:[%s3294_s21 + $0x80] sm:$0xff] %v327_v16  ;;  %330 = vst [vmem:[%s3294_s21 + $0x88] sm:$0xff] %v329_v17  ;;  %v331_v18 = vld [vmem:[%s3289_s20 + $0x120] sm:$0xff]  ;;  %v333_v19 = vld [vmem:[%s3289_s20 + $0x130] sm:$0xff] }
  0x28   : > { %v335_v20 = vld [vmem:[%s3289_s20 + $0x140] sm:$0xff]  ;;  %332 = vst [vmem:[%s3294_s21 + $0x90] sm:$0xff] %v331_v18  ;;  %334 = vst [vmem:[%s3294_s21 + $0x98] sm:$0xff] %v333_v19  ;;  %v337_v21 = vld [vmem:[%s3289_s20 + $0x150] sm:$0xff] }
  0x29   : > { %336 = vst [vmem:[%s3294_s21 + $0xa0] sm:$0xff] %v335_v20  ;;  %v339_v22 = vld [vmem:[%s3289_s20 + $0x160] sm:$0xff]  ;;  %v341_v23 = vld [vmem:[%s3289_s20 + $0x170] sm:$0xff]  ;;  %338 = vst [vmem:[%s3294_s21 + $0xa8] sm:$0xff] %v337_v21 }
  0x2a   : > { %340 = vst [vmem:[%s3294_s21 + $0xb0] sm:$0xff] %v339_v22  ;;  %342 = vst [vmem:[%s3294_s21 + $0xb8] sm:$0xff] %v341_v23  ;;  %v343_v24 = vld [vmem:[%s3289_s20 + $0x180] sm:$0xff]  ;;  %v345_v25 = vld [vmem:[%s3289_s20 + $0x190] sm:$0xff] }
  0x2b   : > { %v347_v26 = vld [vmem:[%s3289_s20 + $0x1a0] sm:$0xff]  ;;  %344 = vst [vmem:[%s3294_s21 + $0xc0] sm:$0xff] %v343_v24  ;;  %346 = vst [vmem:[%s3294_s21 + $0xc8] sm:$0xff] %v345_v25  ;;  %v349_v27 = vld [vmem:[%s3289_s20 + $0x1b0] sm:$0xff] }
  0x2c   : > { %348 = vst [vmem:[%s3294_s21 + $0xd0] sm:$0xff] %v347_v26  ;;  %v351_v28 = vld [vmem:[%s3289_s20 + $0x1c0] sm:$0xff]  ;;  %v353_v29 = vld [vmem:[%s3289_s20 + $0x1d0] sm:$0xff]  ;;  %350 = vst [vmem:[%s3294_s21 + $0xd8] sm:$0xff] %v349_v27 }
  0x2d   : > { %352 = vst [vmem:[%s3294_s21 + $0xe0] sm:$0xff] %v351_v28  ;;  %354 = vst [vmem:[%s3294_s21 + $0xe8] sm:$0xff] %v353_v29  ;;  %v355_v30 = vld [vmem:[%s3289_s20 + $0x1e0] sm:$0xff]  ;;  %v357_v31 = vld [vmem:[%s3289_s20 + $0x1f0] sm:$0xff] }
  0x2e   : > { %v359_v32 = vld [vmem:[%s3289_s20 + $0x200] sm:$0xff]  ;;  %356 = vst [vmem:[%s3294_s21 + $0xf0] sm:$0xff] %v355_v30  ;;  %358 = vst [vmem:[%s3294_s21 + $0xf8] sm:$0xff] %v357_v31  ;;  %v361_v33 = vld [vmem:[%s3289_s20 + $0x210] sm:$0xff] }
  0x2f   : > { %360 = vst [vmem:[%s3294_s21 + $0x100] sm:$0xff] %v359_v32  ;;  %v363_v34 = vld [vmem:[%s3289_s20 + $0x220] sm:$0xff]  ;;  %v365_v35 = vld [vmem:[%s3289_s20 + $0x230] sm:$0xff]  ;;  %362 = vst [vmem:[%s3294_s21 + $0x108] sm:$0xff] %v361_v33 }
  0x30   : > { %364 = vst [vmem:[%s3294_s21 + $0x110] sm:$0xff] %v363_v34  ;;  %366 = vst [vmem:[%s3294_s21 + $0x118] sm:$0xff] %v365_v35  ;;  %v367_v36 = vld [vmem:[%s3289_s20 + $0x240] sm:$0xff]  ;;  %v369_v37 = vld [vmem:[%s3289_s20 + $0x250] sm:$0xff] }
  0x31   : > { %v371_v38 = vld [vmem:[%s3289_s20 + $0x260] sm:$0xff]  ;;  %368 = vst [vmem:[%s3294_s21 + $0x120] sm:$0xff] %v367_v36  ;;  %370 = vst [vmem:[%s3294_s21 + $0x128] sm:$0xff] %v369_v37  ;;  %v373_v39 = vld [vmem:[%s3289_s20 + $0x270] sm:$0xff] }
  0x32   : > { %372 = vst [vmem:[%s3294_s21 + $0x130] sm:$0xff] %v371_v38  ;;  %v375_v40 = vld [vmem:[%s3289_s20 + $0x280] sm:$0xff]  ;;  %v377_v41 = vld [vmem:[%s3289_s20 + $0x290] sm:$0xff]  ;;  %374 = vst [vmem:[%s3294_s21 + $0x138] sm:$0xff] %v373_v39 }
  0x33   : > { %376 = vst [vmem:[%s3294_s21 + $0x140] sm:$0xff] %v375_v40  ;;  %378 = vst [vmem:[%s3294_s21 + $0x148] sm:$0xff] %v377_v41  ;;  %v379_v42 = vld [vmem:[%s3289_s20 + $0x2a0] sm:$0xff]  ;;  %v381_v43 = vld [vmem:[%s3289_s20 + $0x2b0] sm:$0xff] }
  0x34   : > { %v383_v44 = vld [vmem:[%s3289_s20 + $0x2c0] sm:$0xff]  ;;  %380 = vst [vmem:[%s3294_s21 + $0x150] sm:$0xff] %v379_v42  ;;  %382 = vst [vmem:[%s3294_s21 + $0x158] sm:$0xff] %v381_v43  ;;  %v385_v45 = vld [vmem:[%s3289_s20 + $0x2d0] sm:$0xff] }
  0x35   : > { %384 = vst [vmem:[%s3294_s21 + $0x160] sm:$0xff] %v383_v44  ;;  %v387_v46 = vld [vmem:[%s3289_s20 + $0x2e0] sm:$0xff]  ;;  %v389_v47 = vld [vmem:[%s3289_s20 + $0x2f0] sm:$0xff]  ;;  %386 = vst [vmem:[%s3294_s21 + $0x168] sm:$0xff] %v385_v45 }
  0x36   : > { %388 = vst [vmem:[%s3294_s21 + $0x170] sm:$0xff] %v387_v46  ;;  %390 = vst [vmem:[%s3294_s21 + $0x178] sm:$0xff] %v389_v47  ;;  %v391_v48 = vld [vmem:[%s3289_s20 + $0x300] sm:$0xff]  ;;  %v393_v49 = vld [vmem:[%s3289_s20 + $0x310] sm:$0xff] }
  0x37   : > { %v395_v50 = vld [vmem:[%s3289_s20 + $0x320] sm:$0xff]  ;;  %392 = vst [vmem:[%s3294_s21 + $0x180] sm:$0xff] %v391_v48  ;;  %394 = vst [vmem:[%s3294_s21 + $0x188] sm:$0xff] %v393_v49  ;;  %v397_v51 = vld [vmem:[%s3289_s20 + $0x330] sm:$0xff] }
  0x38   : > { %396 = vst [vmem:[%s3294_s21 + $0x190] sm:$0xff] %v395_v50  ;;  %v399_v52 = vld [vmem:[%s3289_s20 + $0x340] sm:$0xff]  ;;  %v401_v53 = vld [vmem:[%s3289_s20 + $0x350] sm:$0xff]  ;;  %398 = vst [vmem:[%s3294_s21 + $0x198] sm:$0xff] %v397_v51 }
  0x39   : > { %400 = vst [vmem:[%s3294_s21 + $0x1a0] sm:$0xff] %v399_v52  ;;  %402 = vst [vmem:[%s3294_s21 + $0x1a8] sm:$0xff] %v401_v53 }
  0x3a PF: > { %p2253_p12 = scmp.ge.s32.totalorder %s3179_s19, 1  ;;  %p421_p13 = scmp.lt.s32.totalorder %s3179_s19, 5 }
  0x3c   : > { %p422_p0 = pnand %p2253_p12, %p421_p13 }
  0x3e   : > { %425 = sbr.rel (%p422_p0) target bundleno = 663 (0x297), region = 66 }
  0x45   : > { %p459_p1 = scmp.lt.s32.totalorder %s3167_s16, 1  ;;  %s3405_s24 = sand.u32 1, %s3155_s13   ;;  %v4630_v54 = vmov 0.0|0.0  }
  0x46   : > { %2582 = vmatprep.subr.bf16.mxu1 %v4630_v54  ;;  %2630 = vmatprep.subr.bf16.mxu0 %v4630_v54  ;;  %s3008_s25 = smul.u32 432, %s3405_s24  ;;  %s2254_s11 = sshll.u32 %s3405_s24, 8 }
  0x47   : > { %s3411_s28 = scalar_select %p459_p1, %s3167_s16, 1 }
  0x48   : > { %s3414_s30 = scalar_lea.vmem [#allocation2], %s3008_s25  ;;  %s4473_s20 = scalar_lea.vmem [#allocation3], %s2254_s11 }
  0x49   : > { %s3009_s29 = smul.u32 1152, %s3411_s28  ;;  %v499_v55 = vld [vmem:[%s3414_s30 + $0x1] sm:$0xff]  ;;  %v3418_v56 = vld [vmem:[%s3414_s30 + $0x18] sm:$0xff]  ;;  %s466_s10 = scalar_lea.vmem %s4628_s2, %s3411_s28 }
  0x4a   : > { %972 = vmatprep.mubr.f32.mxu1 %v499_v55  ;;  %1197 = vmatprep.mubr.f32.mxu0 %v3418_v56  ;;  %s2450_s21 = sshll.u32 %s3163_s15, 6  ;;  %s2144_s25 = sshll.u32 %s4473_s20, 4  ;;  %s4570_s25 = int_to_ptr.vmem [resolvable:$true] %s2144_s25 }
  0x4b   : > { %s3424_s7 = scalar_lea.vmem %s4627_s1, %s3009_s29  ;;  %s2141_s15 = sadd.s32 %s3167_s16, %s2450_s21 }
  0x4c   : > { %v757_v57 = vld [vmem:[%s3424_s7] sm:$0xff]  ;;  %v758_v58 = vld [vmem:[%s3424_s7 + $0x8] sm:$0xff]  ;;  %v759_v62 = vld [vmem:[%s3424_s7 + $0x10] sm:$0xff]  ;;  %s2451_s16 = sshll.u32 %s2141_s15, 7  ;;  %s2130_s5 = scalar_lea.sflag [#allocation4], %s3405_s24 }
  0x4d   : > { %v789_v59 = vld [vmem:[%s3424_s7 + $0x100] sm:$0xff]  ;;  %v2583_v60 = vpack.c.bf16 %v758_v58, %v757_v57  ;;  %v790_v61 = vld [vmem:[%s3424_s7 + $0x108] sm:$0xff]  ;;  %v760_v63 = vld [vmem:[%s3424_s7 + $0x18] sm:$0xff]  ;;  %s3085_s6 = scalar_lea.vmem %s4570_s25, 4096 }
  0x4e   : > { %v2631_v0 = vpack.c.bf16 %v790_v61, %v789_v59  ;;  %v791_v1 = vld [vmem:[%s3424_s7 + $0x110] sm:$0xff]  ;;  %v792_v2 = vld [vmem:[%s3424_s7 + $0x118] sm:$0xff]  ;;  %v2586_v3 = vpack.c.bf16 %v760_v63, %v759_v62  ;;  %v761_v5 = vld [vmem:[%s3424_s7 + $0x20] sm:$0xff]  ;;  %p3086_p2 = scmp.ne.s32.totalorder %s4570_s25, %s3085_s6 }
  0x4f   : > { %2584 = vmatpush1.bf16.msra.mxu1 %v2583_v60  ;;  %v2634_v4 = vpack.c.bf16 %v792_v2, %v791_v1  ;;  %v762_v6 = vld [vmem:[%s3424_s7 + $0x28] sm:$0xff]  ;;  %v793_v7 = vld [vmem:[%s3424_s7 + $0x120] sm:$0xff]  ;;  %v763_v11 = vld [vmem:[%s3424_s7 + $0x30] sm:$0xff] }
  0x50   : > { %2632 = vmatpush1.bf16.msra.mxu0 %v2631_v0  ;;  %2585 = vmatprep.subr.bf16.mxu1 %v4630_v54  ;;  %v794_v8 = vld [vmem:[%s3424_s7 + $0x128] sm:$0xff]  ;;  %v2589_v9 = vpack.c.bf16 %v762_v6, %v761_v5  ;;  %v764_v12 = vld [vmem:[%s3424_s7 + $0x38] sm:$0xff]  ;;  %v795_v13 = vld [vmem:[%s3424_s7 + $0x130] sm:$0xff]  ;;  %p3087_p3 = pnand %p3086_p2, %p3266_p8 }
  0x51   : > { %2633 = vmatprep.subr.bf16.mxu0 %v4630_v54  ;;  %v2637_v10 = vpack.c.bf16 %v794_v8, %v793_v7  ;;  %v796_v14 = vld [vmem:[%s3424_s7 + $0x138] sm:$0xff]  ;;  %v2592_v15 = vpack.c.bf16 %v764_v12, %v763_v11  ;;  %v765_v17 = vld [vmem:[%s3424_s7 + $0x40] sm:$0xff]  ;;  %v766_v18 = vld [vmem:[%s3424_s7 + $0x48] sm:$0xff] }
  0x52   : > { %v2640_v16 = vpack.c.bf16 %v796_v14, %v795_v13  ;;  %v797_v19 = vld [vmem:[%s3424_s7 + $0x140] sm:$0xff]  ;;  %v798_v20 = vld [vmem:[%s3424_s7 + $0x148] sm:$0xff]  ;;  %v2595_v21 = vpack.c.bf16 %v766_v18, %v765_v17  ;;  %v767_v23 = vld [vmem:[%s3424_s7 + $0x50] sm:$0xff]  ;;  %p3088_p4 = pneg %p3087_p3 }
  0x53   : > { %2587 = vmatpush1.bf16.msra.mxu1 %v2586_v3  ;;  %v2643_v22 = vpack.c.bf16 %v798_v20, %v797_v19  ;;  %v768_v24 = vld [vmem:[%s3424_s7 + $0x58] sm:$0xff]  ;;  %v799_v25 = vld [vmem:[%s3424_s7 + $0x150] sm:$0xff]  ;;  %v769_v29 = vld [vmem:[%s3424_s7 + $0x60] sm:$0xff] }
  0x54   : > { %2635 = vmatpush1.bf16.msra.mxu0 %v2634_v4  ;;  %2588 = vmatprep.subr.bf16.mxu1 %v4630_v54  ;;  %v800_v26 = vld [vmem:[%s3424_s7 + $0x158] sm:$0xff]  ;;  %v2598_v27 = vpack.c.bf16 %v768_v24, %v767_v23  ;;  %v770_v30 = vld [vmem:[%s3424_s7 + $0x68] sm:$0xff]  ;;  %v801_v31 = vld [vmem:[%s3424_s7 + $0x160] sm:$0xff] }
  0x55   : > { %2636 = vmatprep.subr.bf16.mxu0 %v4630_v54  ;;  %v2646_v28 = vpack.c.bf16 %v800_v26, %v799_v25  ;;  %v802_v32 = vld [vmem:[%s3424_s7 + $0x168] sm:$0xff]  ;;  %v2601_v33 = vpack.c.bf16 %v770_v30, %v769_v29  ;;  %v771_v35 = vld [vmem:[%s3424_s7 + $0x70] sm:$0xff]  ;;  %v772_v36 = vld [vmem:[%s3424_s7 + $0x78] sm:$0xff] }
  0x56   : > { %v2649_v34 = vpack.c.bf16 %v802_v32, %v801_v31  ;;  %v803_v37 = vld [vmem:[%s3424_s7 + $0x170] sm:$0xff]  ;;  %v804_v38 = vld [vmem:[%s3424_s7 + $0x178] sm:$0xff]  ;;  %v2604_v39 = vpack.c.bf16 %v772_v36, %v771_v35  ;;  %v773_v41 = vld [vmem:[%s3424_s7 + $0x80] sm:$0xff] }
  0x57   : > { %2590 = vmatpush1.bf16.msra.mxu1 %v2589_v9  ;;  %v2652_v40 = vpack.c.bf16 %v804_v38, %v803_v37  ;;  %v774_v42 = vld [vmem:[%s3424_s7 + $0x88] sm:$0xff]  ;;  %v805_v43 = vld [vmem:[%s3424_s7 + $0x180] sm:$0xff]  ;;  %v775_v47 = vld [vmem:[%s3424_s7 + $0x90] sm:$0xff] }
  0x58   : > { %2638 = vmatpush1.bf16.msra.mxu0 %v2637_v10  ;;  %2591 = vmatprep.subr.bf16.mxu1 %v4630_v54  ;;  %v806_v44 = vld [vmem:[%s3424_s7 + $0x188] sm:$0xff]  ;;  %v2607_v45 = vpack.c.bf16 %v774_v42, %v773_v41  ;;  %v776_v48 = vld [vmem:[%s3424_s7 + $0x98] sm:$0xff]  ;;  %v807_v49 = vld [vmem:[%s3424_s7 + $0x190] sm:$0xff] }
  0x59   : > { %2639 = vmatprep.subr.bf16.mxu0 %v4630_v54  ;;  %v2655_v46 = vpack.c.bf16 %v806_v44, %v805_v43  ;;  %v808_v50 = vld [vmem:[%s3424_s7 + $0x198] sm:$0xff]  ;;  %v2610_v51 = vpack.c.bf16 %v776_v48, %v775_v47  ;;  %v777_v53 = vld [vmem:[%s3424_s7 + $0xa0] sm:$0xff]  ;;  %v778_v55 = vld [vmem:[%s3424_s7 + $0xa8] sm:$0xff] }
  0x5a   : > { %v2658_v52 = vpack.c.bf16 %v808_v50, %v807_v49  ;;  %v809_v57 = vld [vmem:[%s3424_s7 + $0x1a0] sm:$0xff]  ;;  %v810_v58 = vld [vmem:[%s3424_s7 + $0x1a8] sm:$0xff]  ;;  %v2613_v59 = vpack.c.bf16 %v778_v55, %v777_v53  ;;  %v779_v61 = vld [vmem:[%s3424_s7 + $0xb0] sm:$0xff] }
  0x5b   : > { %2593 = vmatpush1.bf16.msra.mxu1 %v2592_v15  ;;  %v2661_v60 = vpack.c.bf16 %v810_v58, %v809_v57  ;;  %v780_v62 = vld [vmem:[%s3424_s7 + $0xb8] sm:$0xff]  ;;  %v811_v63 = vld [vmem:[%s3424_s7 + $0x1b0] sm:$0xff]  ;;  %v781_v3 = vld [vmem:[%s3424_s7 + $0xc0] sm:$0xff] }
  0x5c   : > { %2641 = vmatpush1.bf16.msra.mxu0 %v2640_v16  ;;  %2594 = vmatprep.subr.bf16.mxu1 %v4630_v54  ;;  %v812_v0 = vld [vmem:[%s3424_s7 + $0x1b8] sm:$0xff]  ;;  %v2616_v1 = vpack.c.bf16 %v780_v62, %v779_v61  ;;  %v782_v4 = vld [vmem:[%s3424_s7 + $0xc8] sm:$0xff]  ;;  %v813_v5 = vld [vmem:[%s3424_s7 + $0x1c0] sm:$0xff] }
  0x5d   : > { %2642 = vmatprep.subr.bf16.mxu0 %v4630_v54  ;;  %v2664_v2 = vpack.c.bf16 %v812_v0, %v811_v63  ;;  %v814_v6 = vld [vmem:[%s3424_s7 + $0x1c8] sm:$0xff]  ;;  %v2619_v7 = vpack.c.bf16 %v782_v4, %v781_v3  ;;  %v783_v9 = vld [vmem:[%s3424_s7 + $0xd0] sm:$0xff]  ;;  %v784_v10 = vld [vmem:[%s3424_s7 + $0xd8] sm:$0xff] }
  0x5e   : > { %v2667_v8 = vpack.c.bf16 %v814_v6, %v813_v5  ;;  %v815_v11 = vld [vmem:[%s3424_s7 + $0x1d0] sm:$0xff]  ;;  %v816_v12 = vld [vmem:[%s3424_s7 + $0x1d8] sm:$0xff]  ;;  %v2622_v13 = vpack.c.bf16 %v784_v10, %v783_v9  ;;  %v785_v15 = vld [vmem:[%s3424_s7 + $0xe0] sm:$0xff] }
  0x5f   : > { %2596 = vmatpush1.bf16.msra.mxu1 %v2595_v21  ;;  %v2670_v14 = vpack.c.bf16 %v816_v12, %v815_v11  ;;  %v786_v16 = vld [vmem:[%s3424_s7 + $0xe8] sm:$0xff]  ;;  %v817_v17 = vld [vmem:[%s3424_s7 + $0x1e0] sm:$0xff]  ;;  %v787_v21 = vld [vmem:[%s3424_s7 + $0xf0] sm:$0xff] }
  0x60   : > { %2644 = vmatpush1.bf16.msra.mxu0 %v2643_v22  ;;  %2597 = vmatprep.subr.bf16.mxu1 %v4630_v54  ;;  %v818_v18 = vld [vmem:[%s3424_s7 + $0x1e8] sm:$0xff]  ;;  %v2625_v19 = vpack.c.bf16 %v786_v16, %v785_v15  ;;  %v788_v22 = vld [vmem:[%s3424_s7 + $0xf8] sm:$0xff]  ;;  %v819_v23 = vld [vmem:[%s3424_s7 + $0x1f0] sm:$0xff] }
  0x61   : > { %2645 = vmatprep.subr.bf16.mxu0 %v4630_v54  ;;  %v2673_v20 = vpack.c.bf16 %v818_v18, %v817_v17  ;;  %v820_v24 = vld [vmem:[%s3424_s7 + $0x1f8] sm:$0xff]  ;;  %v2628_v25 = vpack.c.bf16 %v788_v22, %v787_v21  ;;  %v821_v29 = vld [vmem:[%s3424_s7 + $0x200] sm:$0xff]  ;;  %v822_v30 = vld [vmem:[%s3424_s7 + $0x208] sm:$0xff] }
  0x62   : > { %v2676_v26 = vpack.c.bf16 %v820_v24, %v819_v23  ;;  %v467_v31 = vld [vmem:[%s3414_s30] sm:$0xff]  ;;  %v500_v35 = vld [vmem:[%s3414_s30 + $0x9] sm:$0xff]  ;;  %v2259_v55 = vld [vmem:[%s3414_s30 + $0x38] sm:$0xff] }
  0x63   : > { %2599 = vmatpush1.bf16.msra.mxu1 %v2598_v27  ;;  %v853_v27 = vld [vmem:[%s3424_s7 + $0x300] sm:$0xff]  ;;  %v823_v36 = vld [vmem:[%s3424_s7 + $0x210] sm:$0xff]  ;;  %v824_v37 = vld [vmem:[%s3424_s7 + $0x218] sm:$0xff] }
  0x64   : > { %2647 = vmatpush1.bf16.msra.mxu0 %v2646_v28  ;;  %2600 = vmatprep.subr.bf16.mxu1 %v4630_v54  ;;  %v854_v28 = vld [vmem:[%s3424_s7 + $0x308] sm:$0xff]  ;;  %v2257_v38 = vld [vmem:[%s3414_s30 + $0x20] sm:$0xff]  ;;  %v2682_v44 = vpack.c.bf16 %v824_v37, %v823_v36  ;;  %v860_v61 = vld [vmem:[%s3424_s7 + $0x338] sm:$0xff] }
  0x65   : > { %2648 = vmatprep.subr.bf16.mxu0 %v4630_v54  ;;  %v3525_v32 = vpack.c.bf16 %v854_v28, %v853_v27  ;;  %v468_v41 = vld [vmem:[%s3414_s30 + $0x8] sm:$0xff]  ;;  %v3540_v43 = vld [vmem:[%s3414_s30 + $0x19] sm:$0xff]  ;;  %v3575_v63 = vld [vmem:[%s3414_s30 + $0x31] sm:$0xff] }
  0x66   : > { %v532_v42 = vld [vmem:[%s3414_s30 + $0xa] sm:$0xff]  ;;  %v3572_v62 = vld [vmem:[%s3414_s30 + $0x22] sm:$0xff]  ;;  %v3590_v6 = vld [vmem:[%s3414_s30 + $0x32] sm:$0xff] }
  0x67   : > { %2602 = vmatpush1.bf16.msra.mxu1 %v2601_v33  ;;  %v531_v33 = vld [vmem:[%s3414_s30 + $0x2] sm:$0xff]  ;;  %v2261_v9 = vld [vmem:[%s3414_s30 + $0x50] sm:$0xff]  ;;  %v3608_v15 = vld [vmem:[%s3414_s30 + $0x3a] sm:$0xff] }
  0x68   : > { %2650 = vmatpush1.bf16.msra.mxu0 %v2649_v34  ;;  %2603 = vmatprep.subr.bf16.mxu1 %v4630_v54  ;;  %v2679_v34 = vpack.c.bf16 %v822_v30, %v821_v29  ;;  %v825_v47 = vld [vmem:[%s3424_s7 + $0x220] sm:$0xff]  ;;  %v826_v48 = vld [vmem:[%s3424_s7 + $0x228] sm:$0xff]  ;;  %v827_v58 = vld [vmem:[%s3424_s7 + $0x230] sm:$0xff] }
  0x69   : > { %2651 = vmatprep.subr.bf16.mxu0 %v4630_v54  ;;  %v857_v49 = vld [vmem:[%s3424_s7 + $0x320] sm:$0xff]  ;;  %v858_v50 = vld [vmem:[%s3424_s7 + $0x328] sm:$0xff]  ;;  %v2685_v53 = vpack.c.bf16 %v826_v48, %v825_v47  ;;  %v831_v11 = vld [vmem:[%s3424_s7 + $0x250] sm:$0xff] }
  0x6a   : > { %v3561_v57 = vpack.c.bf16 %v858_v50, %v857_v49  ;;  %v2260_v0 = vld [vmem:[%s3414_s30 + $0x48] sm:$0xff]  ;;  %v861_v4 = vld [vmem:[%s3424_s7 + $0x340] sm:$0xff]  ;;  %v835_v29 = vld [vmem:[%s3424_s7 + $0x270] sm:$0xff] }
  0x6b   : > { %2605 = vmatpush1.bf16.msra.mxu1 %v2604_v39  ;;  %v855_v39 = vld [vmem:[%s3424_s7 + $0x310] sm:$0xff]  ;;  %v830_v3 = vld [vmem:[%s3424_s7 + $0x248] sm:$0xff]  ;;  %v832_v12 = vld [vmem:[%s3424_s7 + $0x258] sm:$0xff] }
  0x6c   : > { %2653 = vmatpush1.bf16.msra.mxu0 %v2652_v40  ;;  %2606 = vmatprep.subr.bf16.mxu1 %v4630_v54  ;;  %v856_v40 = vld [vmem:[%s3424_s7 + $0x318] sm:$0xff]  ;;  %v862_v5 = vld [vmem:[%s3424_s7 + $0x348] sm:$0xff]  ;;  %v2694_v17 = vpack.c.bf16 %v832_v12, %v831_v11  ;;  %v2262_v18 = vld [vmem:[%s3414_s30 + $0x60] sm:$0xff] }
  0x6d   : > { %2654 = vmatprep.subr.bf16.mxu0 %v4630_v54  ;;  %v3598_v10 = vpack.c.bf16 %v862_v5, %v861_v4  ;;  %v3611_v16 = vld [vmem:[%s3414_s30 + $0x49] sm:$0xff]  ;;  %v2264_v37 = vld [vmem:[%s3414_s30 + $0x78] sm:$0xff]  ;;  %v2265_v48 = vld [vmem:[%s3414_s30 + $0x80] sm:$0xff] }
  0x6e   : > { %v834_v21 = vld [vmem:[%s3424_s7 + $0x268] sm:$0xff]  ;;  %v865_v22 = vld [vmem:[%s3424_s7 + $0x360] sm:$0xff]  ;;  %v836_v30 = vld [vmem:[%s3424_s7 + $0x278] sm:$0xff] }
  0x6f   : > { %2608 = vmatpush1.bf16.msra.mxu1 %v2607_v45  ;;  %v2258_v45 = vld [vmem:[%s3414_s30 + $0x30] sm:$0xff]  ;;  %v866_v23 = vld [vmem:[%s3424_s7 + $0x368] sm:$0xff]  ;;  %v2700_v36 = vpack.c.bf16 %v836_v30, %v835_v29 }
  0x70   : > { %2656 = vmatpush1.bf16.msra.mxu0 %v2655_v46  ;;  %2609 = vmatprep.subr.bf16.mxu1 %v4630_v54  ;;  %v3544_v46 = vpack.c.bf16 %v856_v40, %v855_v39  ;;  %v3626_v24 = vld [vmem:[%s3414_s30 + $0x4a] sm:$0xff]  ;;  %v3634_v28 = vpack.c.bf16 %v866_v23, %v865_v22  ;;  %v3707_v12 = vld [vmem:[%s3414_s30 + $0x98] sm:$0xff] }
  0x71   : > { %2657 = vmatprep.subr.bf16.mxu0 %v4630_v54  ;;  %v2263_v27 = vld [vmem:[%s3414_s30 + $0x68] sm:$0xff]  ;;  %v837_v39 = vld [vmem:[%s3424_s7 + $0x280] sm:$0xff]  ;;  %v839_v50 = vld [vmem:[%s3424_s7 + $0x290] sm:$0xff] }
  0x72   : > { %v838_v40 = vld [vmem:[%s3424_s7 + $0x288] sm:$0xff]  ;;  %v873_v4 = vld [vmem:[%s3424_s7 + $0x3a0] sm:$0xff] }
  0x73   : > { %2611 = vmatpush1.bf16.msra.mxu1 %v2610_v51  ;;  %v3553_v51 = vld [vmem:[%s3414_s30 + $0x1a] sm:$0xff]  ;;  %v2703_v47 = vpack.c.bf16 %v838_v40, %v837_v39  ;;  %v3725_v22 = vld [vmem:[%s3414_s30 + $0x91] sm:$0xff] }
  0x74   : > { %2659 = vmatpush1.bf16.msra.mxu0 %v2658_v52  ;;  %2612 = vmatprep.subr.bf16.mxu1 %v4630_v54  ;;  %v3556_v52 = vld [vmem:[%s3414_s30 + $0x21] sm:$0xff]  ;;  %v3749_v40 = vld [vmem:[%s3414_s30 + $0xb0] sm:$0xff] }
  0x75   : > { %2660 = vmatprep.subr.bf16.mxu0 %v4630_v54  ;;  %v874_v5 = vld [vmem:[%s3424_s7 + $0x3a8] sm:$0xff]  ;;  %v845_v29 = vld [vmem:[%s3424_s7 + $0x2c0] sm:$0xff] }
  0x76   : > { %v846_v30 = vld [vmem:[%s3424_s7 + $0x2c8] sm:$0xff] }
  0x77   : > { %2614 = vmatpush1.bf16.msra.mxu1 %v2613_v59  ;;  %v828_v59 = vld [vmem:[%s3424_s7 + $0x238] sm:$0xff]  ;;  %v2715_v39 = vpack.c.bf16 %v846_v30, %v845_v29  ;;  %v851_v29 = vld [vmem:[%s3424_s7 + $0x2f0] sm:$0xff] }
  0x78   : > { %2662 = vmatpush1.bf16.msra.mxu0 %v2661_v60  ;;  %2615 = vmatprep.subr.bf16.mxu1 %v4630_v54  ;;  %v859_v60 = vld [vmem:[%s3424_s7 + $0x330] sm:$0xff]  ;;  %v852_v30 = vld [vmem:[%s3424_s7 + $0x2f8] sm:$0xff] }
  0x79   : > { %2663 = vmatprep.subr.bf16.mxu0 %v4630_v54 }
  0x7b   : > { %2617 = vmatpush1.bf16.msra.mxu1 %v2616_v1  ;;  %v3580_v1 = vpack.c.bf16 %v860_v61, %v859_v60  ;;  %v3683_v60 = vld [vmem:[%s3414_s30 + $0x79] sm:$0xff] }
  0x7c   : > { %2665 = vmatpush1.bf16.msra.mxu0 %v2664_v2  ;;  %2618 = vmatprep.subr.bf16.mxu1 %v4630_v54  ;;  %v829_v2 = vld [vmem:[%s3424_s7 + $0x240] sm:$0xff] }
  0x7d   : > { %2666 = vmatprep.subr.bf16.mxu0 %v4630_v54 }
  0x7f   : > { %2620 = vmatpush1.bf16.msra.mxu1 %v2619_v7  ;;  %v3593_v7 = vld [vmem:[%s3414_s30 + $0x39] sm:$0xff] }
  0x80   : > { %2668 = vmatpush1.bf16.msra.mxu0 %v2667_v8  ;;  %2621 = vmatprep.subr.bf16.mxu1 %v4630_v54  ;;  %v2691_v8 = vpack.c.bf16 %v830_v3, %v829_v2  ;;  %v841_v2 = vld [vmem:[%s3424_s7 + $0x2a0] sm:$0xff]  ;;  %v842_v3 = vld [vmem:[%s3424_s7 + $0x2a8] sm:$0xff] }
  0x81   : > { %2669 = vmatprep.subr.bf16.mxu0 %v4630_v54  ;;  %v2709_v11 = vpack.c.bf16 %v842_v3, %v841_v2  ;;  %v849_v3 = vld [vmem:[%s3424_s7 + $0x2e0] sm:$0xff] }
  0x83   : > { %2623 = vmatpush1.bf16.msra.mxu1 %v2622_v13  ;;  %v863_v13 = vld [vmem:[%s3424_s7 + $0x350] sm:$0xff] }
  0x84   : > { %2671 = vmatpush1.bf16.msra.mxu0 %v2670_v14  ;;  %2624 = vmatprep.subr.bf16.mxu1 %v4630_v54  ;;  %v864_v14 = vld [vmem:[%s3424_s7 + $0x358] sm:$0xff] }
  0x85   : > { %2672 = vmatprep.subr.bf16.mxu0 %v4630_v54 }
  0x87   : > { %2626 = vmatpush1.bf16.msra.mxu1 %v2625_v19  ;;  %v3616_v19 = vpack.c.bf16 %v864_v14, %v863_v13  ;;  %v3711_v13 = vpack.c.bf16 %v874_v5, %v873_v4  ;;  %v843_v14 = vld [vmem:[%s3424_s7 + $0x2b0] sm:$0xff]  ;;  %v850_v4 = vld [vmem:[%s3424_s7 + $0x2e8] sm:$0xff]  ;;  %v881_v5 = vld [vmem:[%s3424_s7 + $0x3e0] sm:$0xff] }
  0x88   : > { %2674 = vmatpush1.bf16.msra.mxu0 %v2673_v20  ;;  %2627 = vmatprep.subr.bf16.mxu1 %v4630_v54  ;;  %v833_v20 = vld [vmem:[%s3424_s7 + $0x260] sm:$0xff] }
  0x89   : > { %2675 = vmatprep.subr.bf16.mxu0 %v4630_v54  ;;  %4695 = vst [vmem:[#allocation6_spill] sm:$0xff] %v3711_v13 }
  0x8b   : > { %2629 = vmatpush1.bf16.msra.mxu1 %v2628_v25  ;;  %v3629_v25 = vld [vmem:[%s3414_s30 + $0x51] sm:$0xff] }
  0x8c   : > { %2677 = vmatpush1.bf16.msra.mxu0 %v2676_v26  ;;  %2806 = vmatprep.subr.bf16.mxu1 %v4630_v54  ;;  %v2697_v26 = vpack.c.bf16 %v834_v21, %v833_v20  ;;  %v876_v20 = vld [vmem:[%s3424_s7 + $0x3b8] sm:$0xff] }
  0x8d   : > { %2678 = vmatprep.subr.bf16.mxu0 %v4630_v54  ;;  %v3722_v21 = vld [vmem:[%s3414_s30 + $0x82] sm:$0xff] }
  0x8e   : > { %973 = vmatmul.mubr.f32.vlgmr.msra.gmra.mrb[0].mxu1 %v467_v31  ;;  %v867_v31 = vld [vmem:[%s3424_s7 + $0x370] sm:$0xff] }
  0x8f   : > { %1198 = vmatmul.mubr.f32.vlgmr.msra.gmra.mrb[0].mxu0 %v531_v33  ;;  %2822 = vmatpush1.bf16.msra.mxu1 %v3525_v32  ;;  %v868_v33 = vld [vmem:[%s3424_s7 + $0x378] sm:$0xff] }
  0x90   : > { %2680 = vmatpush1.bf16.msra.mxu0 %v2679_v34  ;;  %977 = vmatprep.mubr.f32.mxu1 %v500_v35  ;;  %v3644_v34 = vld [vmem:[%s3414_s30 + $0x52] sm:$0xff]  ;;  %v3647_v35 = vld [vmem:[%s3414_s30 + $0x61] sm:$0xff] }
  0x91   : > { %1202 = vmatprep.mubr.f32.mxu0 %v2257_v38  ;;  %2681 = vmatprep.subr.bf16.mxu0 %v4630_v54 }
  0x92   : > { %978 = vmatmul.mubr.f32.gmra.mrb[2].mxu1 %v468_v41  ;;  %2807 = vmatprep.subr.bf16.mxu1 %v4630_v54  ;;  %v869_v41 = vld [vmem:[%s3424_s7 + $0x380] sm:$0xff] }
  0x93   : > { %1203 = vmatmul.mubr.f32.gmra.mrb[2].mxu0 %v532_v42  ;;  %982 = vmatprep.mubr.f32.mxu1 %v3540_v43  ;;  %v870_v42 = vld [vmem:[%s3424_s7 + $0x388] sm:$0xff] }
  0x94   : > { %1207 = vmatprep.mubr.f32.mxu0 %v2258_v45  ;;  %2683 = vmatpush1.bf16.msra.mxu0 %v2682_v44  ;;  %v3662_v44 = vld [vmem:[%s3414_s30 + $0x62] sm:$0xff]  ;;  %v3670_v49 = vpack.c.bf16 %v870_v42, %v869_v41 }
  0x95   : > { %2823 = vmatpush1.bf16.msra.mxu1 %v3544_v46  ;;  %2684 = vmatprep.subr.bf16.mxu0 %v4630_v54  ;;  %v847_v42 = vld [vmem:[%s3424_s7 + $0x2d0] sm:$0xff] }
  0x96   : > { %983 = vmatmul.mubr.f32.gmra.mrb[4].mxu1 %v3418_v56  ;;  %2808 = vmatprep.subr.bf16.mxu1 %v4630_v54  ;;  %v2688_v56 = vpack.c.bf16 %v828_v59, %v827_v58  ;;  %v872_v58 = vld [vmem:[%s3424_s7 + $0x398] sm:$0xff] }
  0x97   : > { %1208 = vmatmul.mubr.f32.gmra.mrb[4].mxu0 %v3553_v51  ;;  %987 = vmatprep.mubr.f32.mxu1 %v3556_v52  ;;  %v3680_v59 = vld [vmem:[%s3414_s30 + $0x6a] sm:$0xff] }
  0x98   : > { %1212 = vmatprep.mubr.f32.mxu0 %v2259_v55  ;;  %2686 = vmatpush1.bf16.msra.mxu0 %v2685_v53  ;;  %v840_v53 = vld [vmem:[%s3424_s7 + $0x298] sm:$0xff] }
  0x99   : > { %2824 = vmatpush1.bf16.msra.mxu1 %v3561_v57  ;;  %2687 = vmatprep.subr.bf16.mxu0 %v4630_v54  ;;  %v2706_v61 = vpack.c.bf16 %v840_v53, %v839_v50  ;;  %v880_v50 = vld [vmem:[%s3424_s7 + $0x3d8] sm:$0xff] }
  0x9a   : > { %988 = vmatmul.mubr.f32.gmra.mrb[6].mxu1 %v2257_v38  ;;  %2809 = vmatprep.subr.bf16.mxu1 %v4630_v54  ;;  %v3652_v38 = vpack.c.bf16 %v868_v33, %v867_v31  ;;  %v877_v31 = vld [vmem:[%s3424_s7 + $0x3c0] sm:$0xff]  ;;  %v878_v33 = vld [vmem:[%s3424_s7 + $0x3c8] sm:$0xff] }
  0x9b   : > { %1213 = vmatmul.mubr.f32.gmra.mrb[6].mxu0 %v3572_v62  ;;  %992 = vmatprep.mubr.f32.mxu1 %v3575_v63  ;;  %v3753_v41 = vpack.c.bf16 %v878_v33, %v877_v31  ;;  %v3765_v53 = vld [vmem:[%s3414_s30 + $0x9a] sm:$0xff] }
  0x9c   : > { %1217 = vmatprep.mubr.f32.mxu0 %v2260_v0  ;;  %2689 = vmatpush1.bf16.msra.mxu0 %v2688_v56  ;;  %v3686_v56 = vld [vmem:[%s3414_s30 + $0x90] sm:$0xff]  ;;  %4698 = vst [vmem:[#allocation9_spill] sm:$0xff] %v3765_v53  ;;  %v884_v33 = vld [vmem:[%s3424_s7 + $0x3f8] sm:$0xff] }
  0x9d   : > { %2825 = vmatpush1.bf16.msra.mxu1 %v3580_v1  ;;  %2690 = vmatprep.subr.bf16.mxu0 %v4630_v54  ;;  %4697 = vst [vmem:[#allocation8_spill] sm:$0xff] %v3753_v41  ;;  %v883_v31 = vld [vmem:[%s3424_s7 + $0x3f0] sm:$0xff] }
  0x9e   : > { %993 = vmatmul.mubr.f32.gmra.mrb[8].mxu1 %v2258_v45  ;;  %2810 = vmatprep.subr.bf16.mxu1 %v4630_v54  ;;  %v3665_v45 = vld [vmem:[%s3414_s30 + $0x69] sm:$0xff] }
  0x9f   : > { %1218 = vmatmul.mubr.f32.gmra.mrb[8].mxu0 %v3590_v6  ;;  %997 = vmatprep.mubr.f32.mxu1 %v3593_v7 }
  0xa0   : > { %1222 = vmatprep.mubr.f32.mxu0 %v2261_v9  ;;  %2692 = vmatpush1.bf16.msra.mxu0 %v2691_v8  ;;  %v3701_v8 = vld [vmem:[%s3414_s30 + $0x7a] sm:$0xff] }
  0xa1   : > { %2826 = vmatpush1.bf16.msra.mxu1 %v3598_v10  ;;  %2693 = vmatprep.subr.bf16.mxu0 %v4630_v54 }
  0xa2   : > { %998 = vmatmul.mubr.f32.gmra.mrb[10].mxu1 %v2259_v55  ;;  %2811 = vmatprep.subr.bf16.mxu1 %v4630_v54  ;;  %v871_v55 = vld [vmem:[%s3424_s7 + $0x390] sm:$0xff] }
  0xa3   : > { %1223 = vmatmul.mubr.f32.gmra.mrb[10].mxu0 %v3608_v15  ;;  %1002 = vmatprep.mubr.f32.mxu1 %v3611_v16 }
  0xa4   : > { %1227 = vmatprep.mubr.f32.mxu0 %v2262_v18  ;;  %2695 = vmatpush1.bf16.msra.mxu0 %v2694_v17  ;;  %v844_v17 = vld [vmem:[%s3424_s7 + $0x2b8] sm:$0xff] }
  0xa5   : > { %2827 = vmatpush1.bf16.msra.mxu1 %v3616_v19  ;;  %2696 = vmatprep.subr.bf16.mxu0 %v4630_v54  ;;  %v2712_v23 = vpack.c.bf16 %v844_v17, %v843_v14  ;;  %v3787_v14 = vld [vmem:[%s3414_s30 + $0xaa] sm:$0xff] }
  0xa6   : > { %1003 = vmatmul.mubr.f32.gmra.mrb[12].mxu1 %v2260_v0  ;;  %2812 = vmatprep.subr.bf16.mxu1 %v4630_v54  ;;  %v3690_v0 = vpack.c.bf16 %v872_v58, %v871_v55  ;;  %v3768_v55 = vld [vmem:[%s3414_s30 + $0xa9] sm:$0xff]  ;;  %4700 = vst [vmem:[#allocation11_spill] sm:$0xff] %v3787_v14  ;;  %v3790_v17 = vld [vmem:[%s3414_s30 + $0xb1] sm:$0xff] }
  0xa7   : > { %1228 = vmatmul.mubr.f32.gmra.mrb[12].mxu0 %v3626_v24  ;;  %1007 = vmatprep.mubr.f32.mxu1 %v3629_v25 }
  0xa8   : > { %1232 = vmatprep.mubr.f32.mxu0 %v2263_v27  ;;  %2698 = vmatpush1.bf16.msra.mxu0 %v2697_v26  ;;  %v3728_v26 = vld [vmem:[%s3414_s30 + $0xa8] sm:$0xff] }
  0xa9   : > { %2828 = vmatpush1.bf16.msra.mxu1 %v3634_v28  ;;  %2699 = vmatprep.subr.bf16.mxu0 %v4630_v54 }
  0xaa   : > { %1008 = vmatmul.mubr.f32.gmra.mrb[14].mxu1 %v2261_v9  ;;  %2813 = vmatprep.subr.bf16.mxu1 %v4630_v54  ;;  %v3704_v9 = vld [vmem:[%s3414_s30 + $0x81] sm:$0xff] }
  0xab   : > { %1233 = vmatmul.mubr.f32.gmra.mrb[14].mxu0 %v3644_v34  ;;  %1012 = vmatprep.mubr.f32.mxu1 %v3647_v35 }
  0xac   : > { %1237 = vmatprep.mubr.f32.mxu0 %v2264_v37  ;;  %2701 = vmatpush1.bf16.msra.mxu0 %v2700_v36  ;;  %v3743_v36 = vld [vmem:[%s3414_s30 + $0x92] sm:$0xff] }
  0xad   : > { %2829 = vmatpush1.bf16.msra.mxu1 %v3652_v38  ;;  %2702 = vmatprep.subr.bf16.mxu0 %v4630_v54 }
  0xae   : > { %1013 = vmatmul.mubr.f32.gmra.mrb[16].mxu1 %v2262_v18  ;;  %2814 = vmatprep.subr.bf16.mxu1 %v4630_v54  ;;  %v875_v18 = vld [vmem:[%s3424_s7 + $0x3b0] sm:$0xff] }
  0xaf   : > { %1238 = vmatmul.mubr.f32.gmra.mrb[16].mxu0 %v3662_v44  ;;  %1017 = vmatprep.mubr.f32.mxu1 %v3665_v45 }
  0xb0   : > { %1242 = vmatprep.mubr.f32.mxu0 %v2265_v48  ;;  %2704 = vmatpush1.bf16.msra.mxu0 %v2703_v47  ;;  %v848_v47 = vld [vmem:[%s3424_s7 + $0x2d8] sm:$0xff] }
  0xb1   : > { %2830 = vmatpush1.bf16.msra.mxu1 %v3670_v49  ;;  %2705 = vmatprep.subr.bf16.mxu0 %v4630_v54  ;;  %v2718_v58 = vpack.c.bf16 %v848_v47, %v847_v42  ;;  %v886_v42 = vld [vmem:[%s3424_s7 + $0x408] sm:$0xff] }
  0xb2   : > { %1018 = vmatmul.mubr.f32.gmra.mrb[18].mxu1 %v2263_v27  ;;  %2815 = vmatprep.subr.bf16.mxu1 %v4630_v54  ;;  %v3732_v27 = vpack.c.bf16 %v876_v20, %v875_v18  ;;  %v2721_v18 = vpack.c.bf16 %v850_v4, %v849_v3  ;;  %v3793_v20 = vld [vmem:[%s3414_s30 + $0xc8] sm:$0xff]  ;;  %v3811_v47 = vld [vmem:[%s3414_s30 + $0xb2] sm:$0xff]  ;;  %v3821_v3 = vpack.c.bf16 %v884_v33, %v883_v31  ;;  %v3860_v33 = vld [vmem:[%s3414_s30 + $0xda] sm:$0xff] }
  0xb3   : > { %1243 = vmatmul.mubr.f32.gmra.mrb[18].mxu0 %v3680_v59  ;;  %1022 = vmatprep.mubr.f32.mxu1 %v3683_v60  ;;  %4702 = vst [vmem:[#allocation13_spill] sm:$0xff] %v3811_v47  ;;  %v3853_v31 = vld [vmem:[%s3414_s30 + $0xf0] sm:$0xff]  ;;  %4706 = vst [vmem:[#allocation17_spill] sm:$0xff] %v3860_v33 }
  0xb4   : > { %1247 = vmatprep.mubr.f32.mxu0 %v3686_v56  ;;  %2707 = vmatpush1.bf16.msra.mxu0 %v2706_v61  ;;  %4696 = vst [vmem:[#allocation7_spill] sm:$0xff] %v3732_v27  ;;  %v3771_v61 = vld [vmem:[%s3414_s30 + $0xc0] sm:$0xff]  ;;  %4703 = vst [vmem:[#allocation14_spill] sm:$0xff] %v3821_v3 }
  0xb5   : > { %2831 = vmatpush1.bf16.msra.mxu1 %v3690_v0  ;;  %2708 = vmatprep.subr.bf16.mxu0 %v4630_v54 }
  0xb6   : > { %1023 = vmatmul.mubr.f32.gmra.mrb[20].mxu1 %v2264_v37  ;;  %2816 = vmatprep.subr.bf16.mxu1 %v4630_v54  ;;  %v3746_v37 = vld [vmem:[%s3414_s30 + $0x99] sm:$0xff] }
  0xb7   : > { %1248 = vmatmul.mubr.f32.gmra.mrb[20].mxu0 %v3701_v8  ;;  %1027 = vmatprep.mubr.f32.mxu1 %v3704_v9 }
  0xb8   : > { %1252 = vmatprep.mubr.f32.mxu0 %v3707_v12  ;;  %2710 = vmatpush1.bf16.msra.mxu0 %v2709_v11  ;;  %v882_v11 = vld [vmem:[%s3424_s7 + $0x3e8] sm:$0xff] }
  0xb9   : > { %2832 = vmatpush1.bf16.msra.mxu1 %v3711_v13  ;;  %2711 = vmatprep.subr.bf16.mxu0 %v4630_v54  ;;  %v3941_v13 = vld [vmem:[%s3414_s30 + $0x129] sm:$0xff] }
  0xba   : > { %1028 = vmatmul.mubr.f32.gmra.mrb[22].mxu1 %v2265_v48  ;;  %2817 = vmatprep.subr.bf16.mxu1 %v4630_v54  ;;  %v879_v48 = vld [vmem:[%s3424_s7 + $0x3d0] sm:$0xff]  ;;  %4718 = vst [vmem:[#allocation29_spill] sm:$0xff] %v3941_v13 }
  0xbb   : > { %1253 = vmatmul.mubr.f32.gmra.mrb[22].mxu0 %v3722_v21  ;;  %1032 = vmatprep.mubr.f32.mxu1 %v3725_v22  ;;  %v3775_v2 = vpack.c.bf16 %v880_v50, %v879_v48  ;;  %v3814_v48 = vld [vmem:[%s3414_s30 + $0xc1] sm:$0xff]  ;;  %v2724_v50 = vpack.c.bf16 %v852_v30, %v851_v29  ;;  %v3847_v29 = vld [vmem:[%s3414_s30 + $0xca] sm:$0xff]  ;;  %v3850_v30 = vld [vmem:[%s3414_s30 + $0xd9] sm:$0xff] }
  0xbc   : > { %1257 = vmatprep.mubr.f32.mxu0 %v3728_v26  ;;  %2713 = vmatpush1.bf16.msra.mxu0 %v2712_v23  ;;  %v3797_v23 = vpack.c.bf16 %v882_v11, %v881_v5  ;;  %v3831_v5 = vld [vmem:[%s3414_s30 + $0xc2] sm:$0xff]  ;;  %4705 = vst [vmem:[#allocation16_spill] sm:$0xff] %v3847_v29 }
  0xbd   : > { %2833 = vmatpush1.bf16.msra.mxu1 %v3732_v27  ;;  %2714 = vmatprep.subr.bf16.mxu0 %v4630_v54  ;;  %4699 = vst [vmem:[#allocation10_spill] sm:$0xff] %v3775_v2  ;;  %4704 = vst [vmem:[#allocation15_spill] sm:$0xff] %v3831_v5  ;;  %v3834_v11 = vld [vmem:[%s3414_s30 + $0xc9] sm:$0xff]  ;;  %v3928_v27 = vld [vmem:[%s3414_s30 + $0x121] sm:$0xff] }
  0xbe   : > { %1033 = vmatmul.mubr.f32.gmra.mrb[24].mxu1 %v3686_v56  ;;  %2818 = vmatprep.subr.bf16.mxu1 %v4630_v54  ;;  %4701 = vst [vmem:[#allocation12_spill] sm:$0xff] %v3797_v23  ;;  %4715 = vst [vmem:[#allocation26_spill] sm:$0xff] %v3928_v27 }
  0xbf   : > { %1258 = vmatmul.mubr.f32.gmra.mrb[24].mxu0 %v3743_v36  ;;  %1037 = vmatprep.mubr.f32.mxu1 %v3746_v37 }
  0xc0   : > { %1262 = vmatprep.mubr.f32.mxu0 %v3749_v40  ;;  %2716 = vmatpush1.bf16.msra.mxu0 %v2715_v39  ;;  %v885_v39 = vld [vmem:[%s3424_s7 + $0x400] sm:$0xff] }
  0xc1   : > { %2834 = vmatpush1.bf16.msra.mxu1 %v3753_v41  ;;  %2717 = vmatprep.subr.bf16.mxu0 %v4630_v54  ;;  %v3825_v4 = vpack.c.bf16 %v886_v42, %v885_v39  ;;  %v3863_v39 = vld [vmem:[%s3414_s30 + $0xe1] sm:$0xff]  ;;  %v3866_v42 = vld [vmem:[%s3414_s30 + $0xf8] sm:$0xff] }
  0xc2   : > { %1038 = vmatmul.mubr.f32.gmra.mrb[26].mxu1 %v3707_v12  ;;  %2819 = vmatprep.subr.bf16.mxu1 %v4630_v54  ;;  %v3915_v41 = vld [vmem:[%s3414_s30 + $0x111] sm:$0xff] }
  0xc3   : > { %1263 = vmatmul.mubr.f32.gmra.mrb[26].mxu0 %v3765_v53  ;;  %1042 = vmatprep.mubr.f32.mxu1 %v3768_v55  ;;  %v3944_v53 = vld [vmem:[%s3414_s30 + $0x140] sm:$0xff] }
  0xc4   : > { %1267 = vmatprep.mubr.f32.mxu0 %v3771_v61  ;;  %2719 = vmatpush1.bf16.msra.mxu0 %v2718_v58  ;;  %v3817_v58 = vld [vmem:[%s3414_s30 + $0xd8] sm:$0xff]  ;;  %4719 = vst [vmem:[#allocation30_spill] sm:$0xff] %v3944_v53 }
  0xc5   : > { %2835 = vmatpush1.bf16.msra.mxu1 %v3775_v2  ;;  %2720 = vmatprep.subr.bf16.mxu0 %v4630_v54  ;;  %v3902_v2 = vld [vmem:[%s3414_s30 + $0x109] sm:$0xff] }
  0xc6   : > { %1043 = vmatmul.mubr.f32.gmra.mrb[28].mxu1 %v3728_v26  ;;  %2820 = vmatprep.subr.bf16.mxu1 %v4630_v54 }
  0xc7   : > { %1268 = vmatmul.mubr.f32.gmra.mrb[28].mxu0 %v3787_v14  ;;  %1047 = vmatprep.mubr.f32.mxu1 %v3790_v17  ;;  %v3931_v14 = vld [vmem:[%s3414_s30 + $0x138] sm:$0xff] }
  0xc8   : > { %1272 = vmatprep.mubr.f32.mxu0 %v3793_v20  ;;  %2722 = vmatpush1.bf16.msra.mxu0 %v2721_v18  ;;  %v3837_v18 = vld [vmem:[%s3414_s30 + $0xe0] sm:$0xff]  ;;  %4716 = vst [vmem:[#allocation27_spill] sm:$0xff] %v3931_v14 }
  0xc9   : > { %2836 = vmatpush1.bf16.msra.mxu1 %v3797_v23  ;;  %2723 = vmatprep.subr.bf16.mxu0 %v4630_v54  ;;  %v3889_v23 = vld [vmem:[%s3414_s30 + $0xf9] sm:$0xff] }
  0xca   : > { %1048 = vmatmul.mubr.f32.gmra.mrb[30].mxu1 %v3749_v40  ;;  %2821 = vmatprep.subr.bf16.mxu1 %v4630_v54 }
  0xcb   : > { %1273 = vmatmul.mubr.f32.gmra.mrb[30].mxu0 %v3811_v47  ;;  %1052 = vmatprep.mubr.f32.mxu1 %v3814_v48  ;;  %v3918_v47 = vld [vmem:[%s3414_s30 + $0x128] sm:$0xff] }
  0xcc   : > { %1277 = vmatprep.mubr.f32.mxu0 %v3817_v58  ;;  %2725 = vmatpush1.bf16.msra.mxu0 %v2724_v50  ;;  %v3873_v50 = vld [vmem:[%s3414_s30 + $0xe2] sm:$0xff]  ;;  %4713 = vst [vmem:[#allocation24_spill] sm:$0xff] %v3918_v47 }
  0xcd   : > { %2837 = vmatpush1.bf16.msra.mxu1 %v3821_v3  ;;  %2726 = vmatprep.subr.bf16.mxu0 %v4630_v54  ;;  %4707 = vst [vmem:[#allocation18_spill] sm:$0xff] %v3873_v50  ;;  %v3876_v54 = vld [vmem:[%s3414_s30 + $0xf1] sm:$0xff]  ;;  %v3879_v3 = vld [vmem:[%s3414_s30 + $0x108] sm:$0xff] }
  0xce   : > { %1053 = vmatmul.mubr.f32.gmra.mrb[32].mxu1 %v3771_v61  ;;  %2775 = vmatprep.subr.bf16.mxu1 %v3825_v4 }
  0xcf   : > { %1278 = vmatmul.mubr.f32.gmra.mrb[32].mxu0 %v3831_v5  ;;  %1057 = vmatprep.mubr.f32.mxu1 %v3834_v11  ;;  %v3905_v5 = vld [vmem:[%s3414_s30 + $0x120] sm:$0xff] }
  0xd0   : > { %1282 = vmatprep.mubr.f32.mxu0 %v3837_v18  ;;  %4711 = vst [vmem:[#allocation22_spill] sm:$0xff] %v3905_v5 }
  0xd2   : > { %1058 = vmatmul.mubr.f32.gmra.mrb[34].mxu1 %v3793_v20 }
  0xd3   : > { %1283 = vmatmul.mubr.f32.gmra.mrb[34].mxu0 %v3847_v29  ;;  %1062 = vmatprep.mubr.f32.mxu1 %v3850_v30  ;;  %v3892_v29 = vld [vmem:[%s3414_s30 + $0x110] sm:$0xff] }
  0xd4   : > { %1287 = vmatprep.mubr.f32.mxu0 %v3853_v31  ;;  %4709 = vst [vmem:[#allocation20_spill] sm:$0xff] %v3892_v29 }
  0xd6   : > { %1063 = vmatmul.mubr.f32.gmra.mrb[36].mxu1 %v3817_v58 }
  0xd7   : > { %1288 = vmatmul.mubr.f32.gmra.mrb[36].mxu0 %v3860_v33  ;;  %1067 = vmatprep.mubr.f32.mxu1 %v3863_v39  ;;  %v3886_v33 = vld [vmem:[%s3414_s30 + $0xf2] sm:$0xff] }
  0xd8   : > { %1292 = vmatprep.mubr.f32.mxu0 %v3866_v42  ;;  %4708 = vst [vmem:[#allocation19_spill] sm:$0xff] %v3886_v33 }
  0xda   : > { %1068 = vmatmul.mubr.f32.gmra.mrb[38].mxu1 %v3837_v18 }
  0xdb   : > { %1293 = vmatmul.mubr.f32.gmra.mrb[38].mxu0 %v3873_v50  ;;  %1072 = vmatprep.mubr.f32.mxu1 %v3876_v54  ;;  %v3899_v50 = vld [vmem:[%s3414_s30 + $0xfa] sm:$0xff] }
  0xdc   : > { %1297 = vmatprep.mubr.f32.mxu0 %v3879_v3  ;;  %4710 = vst [vmem:[#allocation21_spill] sm:$0xff] %v3899_v50 }
  0xde   : > { %1073 = vmatmul.mubr.f32.gmra.mrb[40].mxu1 %v3853_v31 }
  0xdf   : > { %1298 = vmatmul.mubr.f32.gmra.mrb[40].mxu0 %v3886_v33  ;;  %1077 = vmatprep.mubr.f32.mxu1 %v3889_v23  ;;  %v3912_v33 = vld [vmem:[%s3414_s30 + $0x10a] sm:$0xff] }
  0xe0   : > { %1302 = vmatprep.mubr.f32.mxu0 %v3892_v29  ;;  %4712 = vst [vmem:[#allocation23_spill] sm:$0xff] %v3912_v33 }
  0xe2   : > { %1078 = vmatmul.mubr.f32.gmra.mrb[42].mxu1 %v3866_v42 }
  0xe3   : > { %1303 = vmatmul.mubr.f32.gmra.mrb[42].mxu0 %v3899_v50  ;;  %1082 = vmatprep.mubr.f32.mxu1 %v3902_v2  ;;  %v3925_v50 = vld [vmem:[%s3414_s30 + $0x112] sm:$0xff] }
  0xe4   : > { %1307 = vmatprep.mubr.f32.mxu0 %v3905_v5  ;;  %4714 = vst [vmem:[#allocation25_spill] sm:$0xff] %v3925_v50 }
  0xe6   : > { %1083 = vmatmul.mubr.f32.gmra.mrb[44].mxu1 %v3879_v3 }
  0xe7   : > { %1308 = vmatmul.mubr.f32.gmra.mrb[44].mxu0 %v3912_v33  ;;  %1087 = vmatprep.mubr.f32.mxu1 %v3915_v41  ;;  %v3938_v33 = vld [vmem:[%s3414_s30 + $0x122] sm:$0xff] }
  0xe8   : > { %1312 = vmatprep.mubr.f32.mxu0 %v3918_v47  ;;  %4717 = vst [vmem:[#allocation28_spill] sm:$0xff] %v3938_v33 }
  0xea   : > { %1088 = vmatmul.mubr.f32.gmra.mrb[46].mxu1 %v3892_v29  ;;  %v3957_v29 = vld [vmem:[%s3414_s30 + $0x150] sm:$0xff] }
  0xeb   : > { %1313 = vmatmul.mubr.f32.gmra.mrb[46].mxu0 %v3925_v50  ;;  %1092 = vmatprep.mubr.f32.mxu1 %v3928_v27  ;;  %v3951_v50 = vld [vmem:[%s3414_s30 + $0x12a] sm:$0xff]  ;;  %v3954_v27 = vld [vmem:[%s3414_s30 + $0x139] sm:$0xff]  ;;  %4722 = vst [vmem:[#allocation33_spill] sm:$0xff] %v3957_v29 }
  0xec   : > { %1317 = vmatprep.mubr.f32.mxu0 %v3931_v14  ;;  %4720 = vst [vmem:[#allocation31_spill] sm:$0xff] %v3951_v50  ;;  %4721 = vst [vmem:[#allocation32_spill] sm:$0xff] %v3954_v27 }
  0xee   : > { %1093 = vmatmul.mubr.f32.gmra.mrb[48].mxu1 %v3905_v5  ;;  %v3970_v5 = vld [vmem:[%s3414_s30 + $0x158] sm:$0xff] }
  0xef   : > { %1318 = vmatmul.mubr.f32.gmra.mrb[48].mxu0 %v3938_v33  ;;  %1097 = vmatprep.mubr.f32.mxu1 %v3941_v13  ;;  %v3964_v33 = vld [vmem:[%s3414_s30 + $0x13a] sm:$0xff] }
  0xf0   : > { %1322 = vmatprep.mubr.f32.mxu0 %v3944_v53  ;;  %4723 = vst [vmem:[#allocation34_spill] sm:$0xff] %v3964_v33  ;;  %v3967_v13 = vld [vmem:[%s3414_s30 + $0x141] sm:$0xff] }
  0xf1   : > { %4724 = vst [vmem:[#allocation35_spill] sm:$0xff] %v3967_v13 }
  0xf2   : > { %1098 = vmatmul.mubr.f32.gmra.mrb[50].mxu1 %v3918_v47  ;;  %v3983_v47 = vld [vmem:[%s3414_s30 + $0x168] sm:$0xff] }
  0xf3   : > { %1323 = vmatmul.mubr.f32.gmra.mrb[50].mxu0 %v3951_v50  ;;  %1102 = vmatprep.mubr.f32.mxu1 %v3954_v27  ;;  %v3977_v50 = vld [vmem:[%s3414_s30 + $0x142] sm:$0xff]  ;;  %v3980_v27 = vld [vmem:[%s3414_s30 + $0x151] sm:$0xff] }
  0xf4   : > { %1327 = vmatprep.mubr.f32.mxu0 %v3957_v29  ;;  %4725 = vst [vmem:[#allocation36_spill] sm:$0xff] %v3977_v50  ;;  %4726 = vst [vmem:[#allocation37_spill] sm:$0xff] %v3980_v27 }
  0xf6   : > { %1103 = vmatmul.mubr.f32.gmra.mrb[52].mxu1 %v3931_v14  ;;  %v3996_v14 = vld [vmem:[%s3414_s30 + $0x170] sm:$0xff] }
  0xf7   : > { %1328 = vmatmul.mubr.f32.gmra.mrb[52].mxu0 %v3964_v33  ;;  %1107 = vmatprep.mubr.f32.mxu1 %v3967_v13  ;;  %v3990_v33 = vld [vmem:[%s3414_s30 + $0x152] sm:$0xff] }
  0xf8   : > { %1332 = vmatprep.mubr.f32.mxu0 %v3970_v5  ;;  %4727 = vst [vmem:[#allocation38_spill] sm:$0xff] %v3990_v33  ;;  %v3993_v13 = vld [vmem:[%s3414_s30 + $0x159] sm:$0xff] }
  0xf9   : > { %4728 = vst [vmem:[#allocation39_spill] sm:$0xff] %v3993_v13 }
  0xfa   : > { %1108 = vmatmul.mubr.f32.gmra.mrb[54].mxu1 %v3944_v53  ;;  %v4009_v53 = vld [vmem:[%s3414_s30 + $0x180] sm:$0xff] }
  0xfb   : > { %1333 = vmatmul.mubr.f32.gmra.mrb[54].mxu0 %v3977_v50  ;;  %1112 = vmatprep.mubr.f32.mxu1 %v3980_v27  ;;  %v4003_v50 = vld [vmem:[%s3414_s30 + $0x15a] sm:$0xff]  ;;  %v4006_v27 = vld [vmem:[%s3414_s30 + $0x169] sm:$0xff]  ;;  %4731 = vst [vmem:[#allocation42_spill] sm:$0xff] %v4009_v53 }
  0xfc   : > { %1337 = vmatprep.mubr.f32.mxu0 %v3983_v47  ;;  %4729 = vst [vmem:[#allocation40_spill] sm:$0xff] %v4003_v50  ;;  %4730 = vst [vmem:[#allocation41_spill] sm:$0xff] %v4006_v27 }
  0xfe   : > { %1113 = vmatmul.mubr.f32.gmra.mrb[56].mxu1 %v3957_v29  ;;  %v4022_v29 = vld [vmem:[%s3414_s30 + $0x188] sm:$0xff] }
  0xff   : > { %1338 = vmatmul.mubr.f32.gmra.mrb[56].mxu0 %v3990_v33  ;;  %1117 = vmatprep.mubr.f32.mxu1 %v3993_v13  ;;  %v4016_v33 = vld [vmem:[%s3414_s30 + $0x16a] sm:$0xff]  ;;  %4734 = vst [vmem:[#allocation45_spill] sm:$0xff] %v4022_v29 }
 0x100   : > { %1342 = vmatprep.mubr.f32.mxu0 %v3996_v14  ;;  %4732 = vst [vmem:[#allocation43_spill] sm:$0xff] %v4016_v33  ;;  %v4019_v13 = vld [vmem:[%s3414_s30 + $0x171] sm:$0xff] }
 0x101   : > { %4733 = vst [vmem:[#allocation44_spill] sm:$0xff] %v4019_v13 }
 0x102   : > { %1118 = vmatmul.mubr.f32.gmra.mrb[58].mxu1 %v3970_v5 }
 0x103   : > { %1343 = vmatmul.mubr.f32.gmra.mrb[58].mxu0 %v4003_v50  ;;  %1122 = vmatprep.mubr.f32.mxu1 %v4006_v27  ;;  %v4029_v50 = vld [vmem:[%s3414_s30 + $0x172] sm:$0xff] }
 0x104   : > { %1347 = vmatprep.mubr.f32.mxu0 %v4009_v53  ;;  %4735 = vst [vmem:[#allocation46_spill] sm:$0xff] %v4029_v50  ;;  %v887_v53 = vld [vmem:[%s3424_s7 + $0x410] sm:$0xff]  ;;  %v888_v27 = vld [vmem:[%s3424_s7 + $0x418] sm:$0xff] }
 0x106   : > { %1123 = vmatmul.mubr.f32.gmra.mrb[60].mxu1 %v3983_v47 }
 0x107   : > { %1348 = vmatmul.mubr.f32.gmra.mrb[60].mxu0 %v4016_v33  ;;  %1127 = vmatprep.mubr.f32.mxu1 %v4019_v13  ;;  %v2778_v33 = vpack.c.bf16 %v888_v27, %v887_v53  ;;  %v890_v13 = vld [vmem:[%s3424_s7 + $0x428] sm:$0xff]  ;;  %v4756_v27 = vld [vmem:[#allocation37_spill] sm:$0xff] }
 0x108   : > { %1352 = vmatprep.mubr.f32.mxu0 %v4022_v29  ;;  %v889_v29 = vld [vmem:[%s3424_s7 + $0x420] sm:$0xff]  ;;  %v4760_v53 = vld [vmem:[#allocation39_spill] sm:$0xff] }
 0x10a   : > { %1128 = vmatmul.mubr.f32.gmra.mrb[62].mxu1 %v3996_v14 }
 0x10b   : > { %1353 = vmatmul.mubr.f32.gmra.mrb[62].mxu0 %v4029_v50  ;;  %1687 = vmatprep.mubr.f32.mxu1 %v3725_v22  ;;  %v4736_v50 = vmov 0.0|0.0  }
 0x10c   : > { %1422 = vmatprep.mubr.f32.mxu0 %v3553_v51  ;;  %v2782_v51 = vpack.c.bf16 %v890_v13, %v889_v29  ;;  %v4752_v13 = vld [vmem:[#allocation35_spill] sm:$0xff]  ;;  %v4770_v29 = vld [vmem:[#allocation28_spill] sm:$0xff] }
 0x10e   : > { %1688 = vmatmul.mubr.f32.vlgmr.msra.gmra.mrb[64].mxu1 %v3686_v56  ;;  %v892_v56 = vld [vmem:[%s3424_s7 + $0x438] sm:$0xff] }
 0x10f   : > { %1423 = vmatmul.mubr.f32.vlgmr.msra.gmra.mrb[0].mxu0 %v3540_v43  ;;  %2777 = vmatpush3.bf16.msra.mxu1 %v3825_v4  ;;  %v891_v43 = vld [vmem:[%s3424_s7 + $0x430] sm:$0xff] }
 0x110   : > { %2728 = vmatpush1.bf16.msra.mxu0 %v3525_v32  ;;  %1427 = vmatprep.mubr.f32.mxu0 %v3572_v62  ;;  %v2786_v32 = vpack.c.bf16 %v892_v56, %v891_v43  ;;  %v894_v62 = vld [vmem:[%s3424_s7 + $0x448] sm:$0xff]  ;;  %v4772_v43 = vld [vmem:[#allocation34_spill] sm:$0xff] }
 0x111   : > { %1692 = vmatprep.mubr.f32.mxu1 %v3746_v37  ;;  %2729 = vmatprep.subr.bf16.mxu0 %v4736_v50  ;;  %v4165_v4 = vld [vmem:[%s3414_s30 + $0x189] sm:$0xff] }
 0x112   : > { %1693 = vmatmul.mubr.f32.gmra.mrb[66].mxu1 %v3707_v12  ;;  %2779 = vmatprep.subr.bf16.mxu1 %v2778_v33  ;;  %v4751_v12 = vld [vmem:[#allocation27_spill] sm:$0xff] }
 0x113   : > { %1428 = vmatmul.mubr.f32.gmra.mrb[2].mxu0 %v3556_v52  ;;  %1697 = vmatprep.mubr.f32.mxu1 %v3768_v55  ;;  %v893_v52 = vld [vmem:[%s3424_s7 + $0x440] sm:$0xff] }
 0x114   : > { %1432 = vmatprep.mubr.f32.mxu0 %v3590_v6  ;;  %2731 = vmatpush1.bf16.msra.mxu0 %v3544_v46  ;;  %v2790_v46 = vpack.c.bf16 %v894_v62, %v893_v52  ;;  %v896_v6 = vld [vmem:[%s3424_s7 + $0x458] sm:$0xff] }
 0x115   : > { %2781 = vmatpush3.bf16.msra.mxu1 %v2778_v33  ;;  %2732 = vmatprep.subr.bf16.mxu0 %v4736_v50  ;;  %v2383_v33 = vld [vmem:[%s3414_s30 + $0x1a0] sm:$0xff]  ;;  %v2418_v56 = vld [vmem:[%s3414_s30 + $0x4a] sm:$0xff]  ;;  %v2419_v62 = vld [vmem:[%s3414_s30 + $0x52] sm:$0xff] }
 0x116   : > { %1698 = vmatmul.mubr.f32.gmra.mrb[68].mxu1 %v3728_v26  ;;  %2783 = vmatprep.subr.bf16.mxu1 %v2782_v51  ;;  %v4755_v26 = vld [vmem:[#allocation30_spill] sm:$0xff] }
 0x117   : > { %1433 = vmatmul.mubr.f32.gmra.mrb[4].mxu0 %v3575_v63  ;;  %1702 = vmatprep.mubr.f32.mxu1 %v3790_v17  ;;  %v895_v63 = vld [vmem:[%s3424_s7 + $0x450] sm:$0xff] }
 0x118   : > { %1437 = vmatprep.mubr.f32.mxu0 %v3608_v15  ;;  %2734 = vmatpush1.bf16.msra.mxu0 %v3561_v57  ;;  %v2794_v57 = vpack.c.bf16 %v896_v6, %v895_v63  ;;  %v898_v15 = vld [vmem:[%s3424_s7 + $0x468] sm:$0xff] }
 0x119   : > { %2735 = vmatprep.subr.bf16.mxu0 %v4736_v50  ;;  %2785 = vmatpush3.bf16.msra.mxu1 %v2782_v51  ;;  %v2417_v51 = vld [vmem:[%s3414_s30 + $0x3a] sm:$0xff]  ;;  %v2420_v63 = vld [vmem:[%s3414_s30 + $0x62] sm:$0xff] }
 0x11a   : > { %1703 = vmatmul.mubr.f32.gmra.mrb[70].mxu1 %v3749_v40  ;;  %2787 = vmatprep.subr.bf16.mxu1 %v2786_v32  ;;  %v4759_v40 = vld [vmem:[#allocation33_spill] sm:$0xff] }
 0x11b   : > { %1438 = vmatmul.mubr.f32.gmra.mrb[6].mxu0 %v3593_v7  ;;  %1707 = vmatprep.mubr.f32.mxu1 %v3814_v48  ;;  %v897_v7 = vld [vmem:[%s3424_s7 + $0x460] sm:$0xff] }
 0x11c   : > { %1442 = vmatprep.mubr.f32.mxu0 %v3626_v24  ;;  %2737 = vmatpush1.bf16.msra.mxu0 %v3580_v1  ;;  %v2798_v1 = vpack.c.bf16 %v898_v15, %v897_v7  ;;  %v900_v24 = vld [vmem:[%s3424_s7 + $0x478] sm:$0xff]  ;;  %v4774_v15 = vld [vmem:[#allocation38_spill] sm:$0xff] }
 0x11d   : > { %2738 = vmatprep.subr.bf16.mxu0 %v4736_v50  ;;  %2789 = vmatpush3.bf16.msra.mxu1 %v2786_v32  ;;  %v2421_v7 = vld [vmem:[%s3414_s30 + $0x6a] sm:$0xff] }
 0x11e   : > { %1708 = vmatmul.mubr.f32.gmra.mrb[72].mxu1 %v3771_v61  ;;  %2791 = vmatprep.subr.bf16.mxu1 %v2790_v46  ;;  %v4762_v61 = vld [vmem:[#allocation41_spill] sm:$0xff] }
 0x11f   : > { %1443 = vmatmul.mubr.f32.gmra.mrb[8].mxu0 %v3611_v16  ;;  %1712 = vmatprep.mubr.f32.mxu1 %v3834_v11  ;;  %v899_v16 = vld [vmem:[%s3424_s7 + $0x470] sm:$0xff]  ;;  %s3182_s7 = smov [#allocation3]  }
 0x120   : > { %1447 = vmatprep.mubr.f32.mxu0 %v3644_v34  ;;  %2740 = vmatpush1.bf16.msra.mxu0 %v3598_v10  ;;  %v2802_v10 = vpack.c.bf16 %v900_v24, %v899_v16  ;;  %v4740_v34 = vld [vmem:[#allocation26_spill] sm:$0xff]  ;;  %s3089_s8 = sshll.u32 %s3182_s7, 4  ;;  %s3090_s8 = int_to_ptr.vmem [resolvable:$false] %s3089_s8 }
 0x121   : > { %2741 = vmatprep.subr.bf16.mxu0 %v4736_v50  ;;  %2793 = vmatpush3.bf16.msra.mxu1 %v2790_v46  ;;  %v4773_v46 = vld [vmem:[#allocation36_spill] sm:$0xff]  ;;  %s3091_s9 = scalar_lea.vmem %s3090_s8, 8192  ;;  %p3092_p5 = scmp.lt.s32.totalorder %s4570_s25, %s3090_s8 }
 0x122   : > { %1713 = vmatmul.mubr.f32.gmra.mrb[74].mxu1 %v3793_v20  ;;  %2795 = vmatprep.subr.bf16.mxu1 %v2794_v57  ;;  %v4764_v20 = vld [vmem:[#allocation44_spill] sm:$0xff]  ;;  %p3093_p6 = scmp.lt.s32.totalorder %s3091_s9, %s3085_s6 }
 0x123   : > { %1448 = vmatmul.mubr.f32.gmra.mrb[10].mxu0 %v3629_v25  ;;  %1717 = vmatprep.mubr.f32.mxu1 %v3850_v30  ;;  %v4738_v25 = vld [vmem:[#allocation6_spill] sm:$0xff] }
 0x124   : > { %1452 = vmatprep.mubr.f32.mxu0 %v3662_v44  ;;  %2743 = vmatpush1.bf16.msra.mxu0 %v3616_v19  ;;  %v4737_v19 = vld [vmem:[#allocation9_spill] sm:$0xff]  ;;  %v4743_v44 = vld [vmem:[#allocation22_spill] sm:$0xff]  ;;  %p3094_p7 = por %p3093_p6, %p3092_p5 }
 0x125   : > { %2744 = vmatprep.subr.bf16.mxu0 %v4736_v50  ;;  %2797 = vmatpush3.bf16.msra.mxu1 %v2794_v57 }
 0x126   : > { %1718 = vmatmul.mubr.f32.gmra.mrb[76].mxu1 %v3817_v58  ;;  %2799 = vmatprep.subr.bf16.mxu1 %v2798_v1  ;;  %v4158_v58 = vld [vmem:[%s3414_s30 + $0x181] sm:$0xff]  ;;  %p3095_p10 = pnand %p3094_p7, %p3088_p4 }
 0x127   : > { %1453 = vmatmul.mubr.f32.gmra.mrb[12].mxu0 %v3647_v35  ;;  %1722 = vmatprep.mubr.f32.mxu1 %v3863_v39  ;;  %v4741_v35 = vld [vmem:[#allocation11_spill] sm:$0xff] }
 0x128   : > { %1457 = vmatprep.mubr.f32.mxu0 %v3680_v59  ;;  %2746 = vmatpush1.bf16.msra.mxu0 %v3634_v28  ;;  %v4739_v28 = vld [vmem:[#allocation20_spill] sm:$0xff] }
 0x129   : > { %2747 = vmatprep.subr.bf16.mxu0 %v4736_v50  ;;  %2801 = vmatpush3.bf16.msra.mxu1 %v2798_v1  ;;  %v4746_v59 = vld [vmem:[#allocation8_spill] sm:$0xff] }
 0x12a   : > { %1723 = vmatmul.mubr.f32.gmra.mrb[78].mxu1 %v3837_v18  ;;  %2803 = vmatprep.subr.bf16.mxu1 %v2802_v10  ;;  %v2382_v18 = vld [vmem:[%s3414_s30 + $0x198] sm:$0xff] }
 0x12b   : > { %1458 = vmatmul.mubr.f32.gmra.mrb[14].mxu0 %v3665_v45  ;;  %1727 = vmatprep.mubr.f32.mxu1 %v3876_v54  ;;  %v4744_v45 = vld [vmem:[#allocation29_spill] sm:$0xff] }
 0x12c   : > { %1462 = vmatprep.mubr.f32.mxu0 %v3701_v8  ;;  %2749 = vmatpush1.bf16.msra.mxu0 %v3652_v38  ;;  %v4742_v38 = vld [vmem:[#allocation7_spill] sm:$0xff] }
 0x12d   : > { %2750 = vmatprep.subr.bf16.mxu0 %v4736_v50  ;;  %2805 = vmatpush3.bf16.msra.mxu1 %v2802_v10  ;;  %v4749_v8 = vld [vmem:[#allocation15_spill] sm:$0xff] }
 0x12e   : > { %1728 = vmatmul.mubr.f32.gmra.mrb[80].mxu1 %v3853_v31  ;;  %v2422_v1 = vld [vmem:[%s3414_s30 + $0x7a] sm:$0xff]  ;;  %v2423_v10 = vld [vmem:[%s3414_s30 + $0x82] sm:$0xff] }
 0x12f   : > { %1463 = vmatmul.mubr.f32.gmra.mrb[16].mxu0 %v3683_v60  ;;  %1732 = vmatprep.mubr.f32.mxu1 %v3889_v23  ;;  %v4747_v60 = vld [vmem:[#allocation24_spill] sm:$0xff] }
 0x130   : > { %1467 = vmatprep.mubr.f32.mxu0 %v3722_v21  ;;  %2752 = vmatpush1.bf16.msra.mxu0 %v3670_v49  ;;  %v4745_v49 = vld [vmem:[#allocation13_spill] sm:$0xff]  ;;  %v4753_v21 = vld [vmem:[#allocation16_spill] sm:$0xff] }
 0x131   : > { %2753 = vmatprep.subr.bf16.mxu0 %v4736_v50 }
 0x132   : > { %1733 = vmatmul.mubr.f32.gmra.mrb[82].mxu1 %v3866_v42  ;;  %v2416_v42 = vld [vmem:[%s3414_s30 + $0x32] sm:$0xff] }
 0x133   : > { %1468 = vmatmul.mubr.f32.gmra.mrb[18].mxu0 %v3704_v9  ;;  %1737 = vmatprep.mubr.f32.mxu1 %v3902_v2  ;;  %v4750_v9 = vld [vmem:[#allocation10_spill] sm:$0xff] }
 0x134   : > { %1472 = vmatprep.mubr.f32.mxu0 %v3743_v36  ;;  %2755 = vmatpush1.bf16.msra.mxu0 %v3690_v0  ;;  %v4748_v0 = vld [vmem:[#allocation32_spill] sm:$0xff]  ;;  %v4757_v36 = vld [vmem:[#allocation17_spill] sm:$0xff] }
 0x135   : > { %2756 = vmatprep.subr.bf16.mxu0 %v4736_v50 }
 0x136   : > { %1738 = vmatmul.mubr.f32.gmra.mrb[84].mxu1 %v3879_v3  ;;  %v4766_v3 = vld [vmem:[#allocation23_spill] sm:$0xff] }
 0x137   : > { %1473 = vmatmul.mubr.f32.gmra.mrb[20].mxu0 %v3725_v22  ;;  %1742 = vmatprep.mubr.f32.mxu1 %v3915_v41  ;;  %v4754_v22 = vld [vmem:[#allocation12_spill] sm:$0xff] }
 0x138   : > { %1477 = vmatprep.mubr.f32.mxu0 %v4737_v19  ;;  %2758 = vmatpush1.bf16.msra.mxu0 %v4738_v25  ;;  %v4775_v19 = vld [vmem:[#allocation40_spill] sm:$0xff] }
 0x139   : > { %2759 = vmatprep.subr.bf16.mxu0 %v4736_v50  ;;  %v2424_v25 = vld [vmem:[%s3414_s30 + $0x92] sm:$0xff] }
 0x13a   : > { %1743 = vmatmul.mubr.f32.gmra.mrb[86].mxu1 %v4739_v28 }
 0x13b   : > { %1478 = vmatmul.mubr.f32.gmra.mrb[22].mxu0 %v3746_v37  ;;  %1747 = vmatprep.mubr.f32.mxu1 %v4740_v34  ;;  %v4758_v37 = vld [vmem:[#allocation14_spill] sm:$0xff] }
 0x13c   : > { %1482 = vmatprep.mubr.f32.mxu0 %v4741_v35  ;;  %2761 = vmatpush1.bf16.msra.mxu0 %v4742_v38  ;;  %v2425_v35 = vld [vmem:[%s3414_s30 + $0x9a] sm:$0xff] }
 0x13d   : > { %2762 = vmatprep.subr.bf16.mxu0 %v4736_v50  ;;  %v4776_v38 = vld [vmem:[#allocation43_spill] sm:$0xff] }
 0x13e   : > { %1748 = vmatmul.mubr.f32.gmra.mrb[88].mxu1 %v4743_v44  ;;  %v2426_v44 = vld [vmem:[%s3414_s30 + $0xaa] sm:$0xff] }
 0x13f   : > { %1483 = vmatmul.mubr.f32.gmra.mrb[24].mxu0 %v3768_v55  ;;  %1752 = vmatprep.mubr.f32.mxu1 %v4744_v45  ;;  %v4761_v55 = vld [vmem:[#allocation18_spill] sm:$0xff] }
 0x140   : > { %1487 = vmatprep.mubr.f32.mxu0 %v4745_v49  ;;  %2764 = vmatpush1.bf16.msra.mxu0 %v4746_v59  ;;  %v2427_v59 = vld [vmem:[%s3414_s30 + $0xb2] sm:$0xff] }
 0x141   : > { %2765 = vmatprep.subr.bf16.mxu0 %v4736_v50 }
 0x142   : > { %1753 = vmatmul.mubr.f32.gmra.mrb[90].mxu1 %v4747_v60  ;;  %v4777_v60 = vld [vmem:[#allocation46_spill] sm:$0xff] }
 0x143   : > { %1488 = vmatmul.mubr.f32.gmra.mrb[26].mxu0 %v3790_v17  ;;  %1757 = vmatprep.mubr.f32.mxu1 %v4748_v0  ;;  %v4763_v17 = vld [vmem:[#allocation19_spill] sm:$0xff] }
 0x144   : > { %1492 = vmatprep.mubr.f32.mxu0 %v4749_v8  ;;  %2767 = vmatpush1.bf16.msra.mxu0 %v4750_v9  ;;  %v4224_v9 = vld [vmem:[%s3414_s30 + $0x182] sm:$0xff] }
 0x145   : > { %2768 = vmatprep.subr.bf16.mxu0 %v4736_v50 }
 0x146   : > { %1758 = vmatmul.mubr.f32.gmra.mrb[92].mxu1 %v4751_v12 }
 0x147   : > { %1493 = vmatmul.mubr.f32.gmra.mrb[28].mxu0 %v3814_v48  ;;  %1762 = vmatprep.mubr.f32.mxu1 %v4752_v13  ;;  %v4765_v48 = vld [vmem:[#allocation21_spill] sm:$0xff] }
 0x148   : > { %1497 = vmatprep.mubr.f32.mxu0 %v4753_v21  ;;  %2770 = vmatpush1.bf16.msra.mxu0 %v4754_v22  ;;  %v2430_v21 = vld [vmem:[%s3414_s30 + $0xda] sm:$0xff] }
 0x149   : > { %2771 = vmatprep.subr.bf16.mxu0 %v4736_v50 }
 0x14a   : > { %1763 = vmatmul.mubr.f32.gmra.mrb[94].mxu1 %v4755_v26  ;;  %v4233_v26 = vld [vmem:[%s3414_s30 + $0x18a] sm:$0xff] }
 0x14b   : > { %1498 = vmatmul.mubr.f32.gmra.mrb[30].mxu0 %v3834_v11  ;;  %1767 = vmatprep.mubr.f32.mxu1 %v4756_v27 }
 0x14c   : > { %1502 = vmatprep.mubr.f32.mxu0 %v4757_v36  ;;  %2773 = vmatpush1.bf16.msra.mxu0 %v4758_v37  ;;  %v2431_v36 = vld [vmem:[%s3414_s30 + $0xe2] sm:$0xff]  ;;  %v2432_v37 = vld [vmem:[%s3414_s30 + $0xf2] sm:$0xff] }
 0x14e   : > { %1768 = vmatmul.mubr.f32.gmra.mrb[96].mxu1 %v4759_v40 }
 0x14f   : > { %1503 = vmatmul.mubr.f32.gmra.mrb[32].mxu0 %v3850_v30  ;;  %1772 = vmatprep.mubr.f32.mxu1 %v4760_v53 }
 0x150   : > { %1507 = vmatprep.mubr.f32.mxu0 %v4761_v55 }
 0x152   : > { %1773 = vmatmul.mubr.f32.gmra.mrb[98].mxu1 %v3970_v5  ;;  %v2414_v5 = vld [vmem:[%s3414_s30 + $0x199] sm:$0xff] }
 0x153   : > { %1508 = vmatmul.mubr.f32.gmra.mrb[34].mxu0 %v3863_v39  ;;  %1777 = vmatprep.mubr.f32.mxu1 %v4762_v61  ;;  %v4771_v39 = vld [vmem:[#allocation31_spill] sm:$0xff] }
 0x154   : > { %1512 = vmatprep.mubr.f32.mxu0 %v4763_v17 }
 0x156   : > { %1778 = vmatmul.mubr.f32.gmra.mrb[100].mxu1 %v3983_v47  ;;  %v4767_v47 = vld [vmem:[#allocation42_spill] sm:$0xff] }
 0x157   : > { %1513 = vmatmul.mubr.f32.gmra.mrb[36].mxu0 %v3876_v54  ;;  %1782 = vmatprep.mubr.f32.mxu1 %v4764_v20  ;;  %v4768_v54 = vld [vmem:[#allocation25_spill] sm:$0xff] }
 0x158   : > { %1517 = vmatprep.mubr.f32.mxu0 %v4765_v48 }
 0x15a   : > { %1783 = vmatmul.mubr.f32.gmra.mrb[102].mxu1 %v3996_v14 }
 0x15b   : > { %1518 = vmatmul.mubr.f32.gmra.mrb[38].mxu0 %v3889_v23  ;;  %1787 = vmatprep.mubr.f32.mxu1 %v4158_v58  ;;  %v4769_v23 = vld [vmem:[#allocation45_spill] sm:$0xff] }
 0x15c   : > { %1522 = vmatprep.mubr.f32.mxu0 %v4766_v3 }
 0x15e   : > { %1788 = vmatmul.mubr.f32.gmra.mrb[104].mxu1 %v4767_v47  ;;  %v2353_v47 = vld [vmem:[%s3414_s30 + $0x38] sm:$0xff] }
 0x15f   : > { %1523 = vmatmul.mubr.f32.gmra.mrb[40].mxu0 %v3902_v2  ;;  %1792 = vmatprep.mubr.f32.mxu1 %v4165_v4  ;;  %v2415_v2 = vld [vmem:[%s3414_s30 + $0x1a1] sm:$0xff] }
 0x160   : > { %1527 = vmatprep.mubr.f32.mxu0 %v4768_v54 }
 0x161   : > { %v4172_v14 = vpop.f32.mrb[0].mxu1 }
 0x162   : > { %1793 = vmatmul.mubr.f32.gmra.mrb[106].mxu1 %v4769_v23  ;;  %v976_v11 = vpop.f32.mrb[1].mxu1 }
 0x163   : > { %1528 = vmatmul.mubr.f32.gmra.mrb[42].mxu0 %v3915_v41  ;;  %1797 = vmatprep.mubr.f32.mxu1 %v2414_v5  ;;  %v2354_v11 = vld [vmem:[%s3414_s30 + $0x48] sm:$0xff] }
 0x164   : > { %1532 = vmatprep.mubr.f32.mxu0 %v4770_v29 }
 0x165   : > { %v4179_v30 = vpop.f32.mrb[2].mxu1 }
 0x166   : > { %1798 = vmatmul.mubr.f32.gmra.mrb[108].mxu1 %v2382_v18  ;;  %v981_v31 = vpop.f32.mrb[3].mxu1  ;;  %v2387_v18 = vld [vmem:[%s3414_s30 + $0x51] sm:$0xff] }
 0x167   : > { %1533 = vmatmul.mubr.f32.gmra.mrb[44].mxu0 %v4740_v34  ;;  %1802 = vmatprep.mubr.f32.mxu1 %v2415_v2  ;;  %v2355_v2 = vld [vmem:[%s3414_s30 + $0x50] sm:$0xff]  ;;  %v2388_v31 = vld [vmem:[%s3414_s30 + $0x61] sm:$0xff] }
 0x168   : > { %1537 = vmatprep.mubr.f32.mxu0 %v4771_v39 }
 0x169   : > { %v4185_v41 = vpop.f32.mrb[4].mxu1 }
 0x16a   : > { %1803 = vmatmul.mubr.f32.gmra.mrb[110].mxu1 %v2383_v33  ;;  %v986_v50 = vpop.f32.mrb[5].mxu1  ;;  %v2356_v33 = vld [vmem:[%s3414_s30 + $0x60] sm:$0xff] }
 0x16b   : > { %1538 = vmatmul.mubr.f32.gmra.mrb[46].mxu0 %v4744_v45  ;;  %2534 = vmatprep.mubr.f32.mxu1 %v2416_v42  ;;  %v2389_v42 = vld [vmem:[%s3414_s30 + $0x69] sm:$0xff] }
 0x16c   : > { %1542 = vmatprep.mubr.f32.mxu0 %v4772_v43 }
 0x16d   : > { %v4191_v32 = vpop.f32.mrb[6].mxu1 }
 0x16e   : > { %2535 = vmatmul.mubr.f32.vlgmr.msra.gmra.mrb[112].mxu1 %v2417_v51  ;;  %v991_v52 = vpop.f32.mrb[7].mxu1  ;;  %v2357_v51 = vld [vmem:[%s3414_s30 + $0x68] sm:$0xff] }
 0x16f   : > { %1543 = vmatmul.mubr.f32.gmra.mrb[48].mxu0 %v4748_v0  ;;  %2537 = vmatprep.mubr.f32.mxu1 %v2418_v56  ;;  %v2428_v0 = vld [vmem:[%s3414_s30 + $0xc2] sm:$0xff]  ;;  %v2390_v56 = vld [vmem:[%s3414_s30 + $0x79] sm:$0xff] }
 0x170   : > { %1547 = vmatprep.mubr.f32.mxu0 %v4773_v46 }
 0x171   : > { %v4197_v6 = vpop.f32.mrb[8].mxu1 }
 0x172   : > { %2538 = vmatmul.mubr.f32.gmra.mrb[114].mxu1 %v2419_v62  ;;  %v996_v57 = vpop.f32.mrb[9].mxu1  ;;  %v2358_v62 = vld [vmem:[%s3414_s30 + $0x78] sm:$0xff] }
 0x173   : > { %1548 = vmatmul.mubr.f32.gmra.mrb[50].mxu0 %v4752_v13  ;;  %2540 = vmatprep.mubr.f32.mxu1 %v2420_v63  ;;  %v2429_v13 = vld [vmem:[%s3414_s30 + $0xca] sm:$0xff]  ;;  %v2391_v57 = vld [vmem:[%s3414_s30 + $0x81] sm:$0xff] }
 0x174   : > { %1552 = vmatprep.mubr.f32.mxu0 %v4774_v15 }
 0x175   : > { %v4203_v16 = vpop.f32.mrb[10].mxu1 }
 0x176   : > { %2541 = vmatmul.mubr.f32.gmra.mrb[116].mxu1 %v2421_v7  ;;  %v1001_v24 = vpop.f32.mrb[11].mxu1 }
 0x177   : > { %1553 = vmatmul.mubr.f32.gmra.mrb[52].mxu0 %v4756_v27  ;;  %2543 = vmatprep.mubr.f32.mxu1 %v2422_v1  ;;  %v2359_v1 = vld [vmem:[%s3414_s30 + $0x80] sm:$0xff] }
 0x178   : > { %1557 = vmatprep.mubr.f32.mxu0 %v4775_v19 }
 0x179   : > { %v4209_v28 = vpop.f32.mrb[12].mxu1 }
 0x17a   : > { %2544 = vmatmul.mubr.f32.gmra.mrb[118].mxu1 %v2423_v10  ;;  %v1006_v34 = vpop.f32.mrb[13].mxu1 }
 0x17b   : > { %1558 = vmatmul.mubr.f32.gmra.mrb[54].mxu0 %v4760_v53  ;;  %2546 = vmatprep.mubr.f32.mxu1 %v2424_v25  ;;  %v2384_v53 = vld [vmem:[%s3414_s30 + $0x31] sm:$0xff] }
 0x17c   : > { %1562 = vmatprep.mubr.f32.mxu0 %v4776_v38 }
 0x17d   : > { %v4215_v45 = vpop.f32.mrb[14].mxu1 }
 0x17e   : > { %2547 = vmatmul.mubr.f32.gmra.mrb[120].mxu1 %v2425_v35  ;;  %v1011_v49 = vpop.f32.mrb[15].mxu1 }
 0x17f   : > { %1563 = vmatmul.mubr.f32.gmra.mrb[56].mxu0 %v4762_v61  ;;  %2549 = vmatprep.mubr.f32.mxu1 %v2426_v44  ;;  %v2352_v61 = vld [vmem:[%s3414_s30 + $0x30] sm:$0xff] }
 0x180   : > { %1567 = vmatprep.mubr.f32.mxu0 %v4777_v60 }
 0x181   : > { %v4221_v8 = vpop.f32.mrb[16].mxu1 }
 0x182   : > { %2550 = vmatmul.mubr.f32.gmra.mrb[122].mxu1 %v2427_v59  ;;  %v1016_v12 = vpop.f32.mrb[17].mxu1 }
 0x183   : > { %1568 = vmatmul.mubr.f32.gmra.mrb[58].mxu0 %v4764_v20  ;;  %2552 = vmatprep.mubr.f32.mxu1 %v2428_v0  ;;  %v2385_v20 = vld [vmem:[%s3414_s30 + $0x39] sm:$0xff] }
 0x184   : > { %1572 = vmatprep.mubr.f32.mxu0 %v4224_v9 }
 0x185   : > { %v4230_v22 = vpop.f32.mrb[18].mxu1 }
 0x186   : > { %2553 = vmatmul.mubr.f32.gmra.mrb[124].mxu1 %v2429_v13  ;;  %v1021_v27 = vpop.f32.mrb[19].mxu1 }
 0x187   : > { %1573 = vmatmul.mubr.f32.gmra.mrb[60].mxu0 %v4158_v58  ;;  %2555 = vmatprep.mubr.f32.mxu1 %v2430_v21 }
 0x188   : > { %1577 = vmatprep.mubr.f32.mxu0 %v4233_v26 }
 0x189   : > { %v4239_v40 = vpop.f32.mrb[20].mxu1 }
 0x18a   : > { %2556 = vmatmul.mubr.f32.gmra.mrb[126].mxu1 %v2431_v36  ;;  %v1026_v55 = vpop.f32.mrb[21].mxu1 }
 0x18b   : > { %1578 = vmatmul.mubr.f32.gmra.mrb[62].mxu0 %v4165_v4  ;;  %2558 = vmatprep.mubr.f32.mxu1 %v2432_v37  ;;  %v2386_v4 = vld [vmem:[%s3414_s30 + $0x49] sm:$0xff] }
 0x18c   : > { %1647 = vmatprep.mubr.f32.mxu0 %v2384_v53 }
 0x18d   : > { %v4244_v17 = vpop.f32.mrb[22].mxu1 }
 0x18e   : > { %2559 = vmatmul.mubr.f32.gmra.mrb[128].mxu1 %v4765_v48  ;;  %v1031_v58 = vpop.f32.mrb[23].mxu1 }
 0x18f   : > { %1648 = vmatmul.mubr.f32.vlgmr.msra.gmra.mrb[0].mxu0 %v2352_v61  ;;  %2561 = vmatprep.mubr.f32.mxu1 %v4766_v3 }
 0x190   : > { %1652 = vmatprep.mubr.f32.mxu0 %v2385_v20 }
 0x191   : > { %v4250_v5 = vpop.f32.mrb[24].mxu1 }
 0x192   : > { %2562 = vmatmul.mubr.f32.gmra.mrb[130].mxu1 %v4768_v54  ;;  %v1036_v23 = vpop.f32.mrb[25].mxu1 }
 0x193   : > { %1653 = vmatmul.mubr.f32.gmra.mrb[2].mxu0 %v2353_v47  ;;  %2564 = vmatprep.mubr.f32.mxu1 %v4770_v29 }
 0x194   : > { %1657 = vmatprep.mubr.f32.mxu0 %v2386_v4 }
 0x195   : > { %v4256_v48 = vpop.f32.mrb[26].mxu1 }
 0x196   : > { %2565 = vmatmul.mubr.f32.gmra.mrb[132].mxu1 %v4771_v39  ;;  %v1041_v3 = vpop.f32.mrb[27].mxu1 }
 0x197   : > { %1658 = vmatmul.mubr.f32.gmra.mrb[4].mxu0 %v2354_v11  ;;  %2567 = vmatprep.mubr.f32.mxu1 %v4772_v43 }
 0x198   : > { %1662 = vmatprep.mubr.f32.mxu0 %v2387_v18 }
 0x199   : > { %v4262_v54 = vpop.f32.mrb[28].mxu1 }
 0x19a   : > { %2568 = vmatmul.mubr.f32.gmra.mrb[134].mxu1 %v4773_v46  ;;  %v1046_v29 = vpop.f32.mrb[29].mxu1  ;;  %v2446_v46 = vld [vmem:[%s3414_s30 + $0x19a] sm:$0xff] }
 0x19b   : > { %1663 = vmatmul.mubr.f32.gmra.mrb[6].mxu0 %v2355_v2  ;;  %2570 = vmatprep.mubr.f32.mxu1 %v4774_v15  ;;  %v2447_v15 = vld [vmem:[%s3414_s30 + $0x1a2] sm:$0xff]  ;;  %s4567_s30 = scalar_lea.hbm %s4629_s3, %s2451_s16 }
 0x19c   : > { %1667 = vmatprep.mubr.f32.mxu0 %v2388_v31 }
 0x19d   : > { %v4268_v39 = vpop.f32.mrb[30].mxu1 }
 0x19e   : > { %2571 = vmatmul.mubr.f32.gmra.mrb[136].mxu1 %v4775_v19  ;;  %v1051_v50 = vpop.f32.mrb[31].mxu1 }
 0x19f   : > { %1668 = vmatmul.mubr.f32.gmra.mrb[8].mxu0 %v2356_v33  ;;  %2573 = vmatprep.mubr.f32.mxu1 %v4776_v38 }
 0x1a0   : > { %1672 = vmatprep.mubr.f32.mxu0 %v2389_v42 }
 0x1a1   : > { %v4274_v43 = vpop.f32.mrb[32].mxu1 }
 0x1a2   : > { %2574 = vmatmul.mubr.f32.gmra.mrb[138].mxu1 %v4777_v60  ;;  %v1056_v52 = vpop.f32.mrb[33].mxu1 }
 0x1a3   : > { %1673 = vmatmul.mubr.f32.gmra.mrb[10].mxu0 %v2357_v51  ;;  %2576 = vmatprep.mubr.f32.mxu1 %v4224_v9 }
 0x1a4   : > { %1677 = vmatprep.mubr.f32.mxu0 %v2390_v56 }
 0x1a5   : > { %v4281_v63 = vpop.f32.mrb[34].mxu1 }
 0x1a6   : > { %2577 = vmatmul.mubr.f32.gmra.mrb[140].mxu1 %v4233_v26  ;;  %v1061_v7 = vpop.f32.mrb[35].mxu1 }
 0x1a7   : > { %1678 = vmatmul.mubr.f32.gmra.mrb[12].mxu0 %v2358_v62  ;;  %2579 = vmatprep.mubr.f32.mxu1 %v2446_v46 }
 0x1a8   : > { %1682 = vmatprep.mubr.f32.mxu0 %v2391_v57 }
 0x1a9   : > { %v4287_v24 = vpop.f32.mrb[36].mxu1 }
 0x1aa   : > { %2580 = vmatmul.mubr.f32.gmra.mrb[142].mxu1 %v2447_v15  ;;  %v1066_v10 = vpop.f32.mrb[37].mxu1  ;;  %v4319_v15 = vld [vmem:[%s466_s10] ss:$0 sm:$0xff] }
 0x1ab   : > { %1683 = vmatmul.mubr.f32.gmra.mrb[14].mxu0 %v2359_v1  ;;  %v1015_v1 = vadd.f32 %v4319_v15, %v4221_v8  ;;  %v1025_v8 = vadd.f32 %v4319_v15, %v4239_v40  ;;  %v1035_v40 = vadd.f32 %v4319_v15, %v4250_v5  ;;  %v1045_v5 = vadd.f32 %v4319_v15, %v4262_v54 }
 0x1ac   : > { %v1055_v54 = vadd.f32 %v4319_v15, %v4274_v43 }
 0x1ad   : > { %v4289_v19 = vpop.f32.mrb[38].mxu1 }
 0x1ae   : > { %v1071_v25 = vpop.f32.mrb[39].mxu1 }
 0x1b1   : > { %v4291_v34 = vpop.f32.mrb[40].mxu1 }
 0x1b2   : > { %v1076_v35 = vpop.f32.mrb[41].mxu1 }
 0x1b5   : > { %v4293_v38 = vpop.f32.mrb[42].mxu1 }
 0x1b6   : > { %v1081_v44 = vpop.f32.mrb[43].mxu1 }
 0x1b9   : > { %v4295_v49 = vpop.f32.mrb[44].mxu1 }
 0x1ba   : > { %v1086_v59 = vpop.f32.mrb[45].mxu1 }
 0x1bd   : > { %v4297_v60 = vpop.f32.mrb[46].mxu1 }
 0x1be   : > { %v1091_v0 = vpop.f32.mrb[47].mxu1 }
 0x1bf   : > { %v1020_v0 = vadd.f32 %v4319_v15, %v4230_v22  ;;  %v1030_v22 = vadd.f32 %v4319_v15, %v4244_v17  ;;  %v1040_v17 = vadd.f32 %v4319_v15, %v4256_v48  ;;  %v1050_v48 = vadd.f32 %v4319_v15, %v4268_v39 }
 0x1c0   : > { %v1060_v39 = vadd.f32 %v4319_v15, %v4281_v63 }
 0x1c1   : > { %v4299_v9 = vpop.f32.mrb[48].mxu1 }
 0x1c2   : > { %v1096_v12 = vpop.f32.mrb[49].mxu1 }
 0x1c5   : > { %v4301_v13 = vpop.f32.mrb[50].mxu1 }
 0x1c6   : > { %v1101_v21 = vpop.f32.mrb[51].mxu1 }
 0x1c9   : > { %v4303_v26 = vpop.f32.mrb[52].mxu1 }
 0x1ca   : > { %v1106_v27 = vpop.f32.mrb[53].mxu1 }
 0x1cd   : > { %v4305_v36 = vpop.f32.mrb[54].mxu1 }
 0x1ce   : > { %v1111_v37 = vpop.f32.mrb[55].mxu1 }
 0x1d1   : > { %v4307_v53 = vpop.f32.mrb[56].mxu1 }
 0x1d2   : > { %v1116_v55 = vpop.f32.mrb[57].mxu1 }
 0x1d5   : > { %v4309_v61 = vpop.f32.mrb[58].mxu1 }
 0x1d6   : > { %v1121_v20 = vpop.f32.mrb[59].mxu1 }
 0x1d9   : > { %v4311_v58 = vpop.f32.mrb[60].mxu1 }
 0x1da   : > { %v1126_v47 = vpop.f32.mrb[61].mxu1 }
 0x1dd   : > { %v4313_v4 = vpop.f32.mrb[62].mxu1 }
 0x1de   : > { %v1131_v23 = vpop.f32.mrb[63].mxu1 }
 0x1e1   : > { %v1689_v11 = vpop.f32.mrb[64].mxu1 }
 0x1e2   : > { %v1691_v18 = vpop.f32.mrb[65].mxu1 }
 0x1e5   : > { %v1694_v3 = vpop.f32.mrb[66].mxu1 }
 0x1e6   : > { %v1696_v2 = vpop.f32.mrb[67].mxu1 }
 0x1e9   : > { %v1699_v31 = vpop.f32.mrb[68].mxu1 }
 0x1ea   : > { %v1701_v29 = vpop.f32.mrb[69].mxu1 }
 0x1ed   : > { %v1704_v33 = vpop.f32.mrb[70].mxu1 }
 0x1ee   : > { %v1706_v42 = vpop.f32.mrb[71].mxu1 }
 0x1f1   : > { %v1709_v50 = vpop.f32.mrb[72].mxu1 }
 0x1f2   : > { %v1711_v51 = vpop.f32.mrb[73].mxu1 }
 0x1f5   : > { %v1714_v56 = vpop.f32.mrb[74].mxu1 }
 0x1f6   : > { %v1716_v52 = vpop.f32.mrb[75].mxu1 }
 0x1f9   : > { %v1719_v62 = vpop.f32.mrb[76].mxu1 }
 0x1fa   : > { %v1721_v46 = vpop.f32.mrb[77].mxu1 }
 0x1fd   : > { %v1724_v57 = vpop.f32.mrb[78].mxu1 }
 0x1fe   : > { %v1726_v7 = vpop.f32.mrb[79].mxu1 }
 0x201   : > { %v4323_v10 = vpop.f32.mrb[80].mxu1 }
 0x202   : > { %v1464_v25 = vpop.f32.mrb[16].mxu0  ;;  %v1731_v35 = vpop.f32.mrb[81].mxu1 }
 0x203   : > { %v2855_v44 = vadd.f32 %v1464_v25, %v1015_v1  ;;  %v1466_v59 = vpop.f32.mrb[17].mxu0 }
 0x205   : > { %v4327_v12 = vpop.f32.mrb[82].mxu1  ;;  %v4329_v21 = vadd.f32 %v2855_v44, %v1689_v11 }
 0x206   : > { %v1469_v27 = vpop.f32.mrb[18].mxu0  ;;  %v1736_v37 = vpop.f32.mrb[83].mxu1 }
 0x207   : > { %v2858_v55 = vadd.f32 %v1469_v27, %v1020_v0  ;;  %v1471_v20 = vpop.f32.mrb[19].mxu0 }
 0x209   : > { %v4333_v47 = vpop.f32.mrb[84].mxu1  ;;  %v4335_v23 = vadd.f32 %v2858_v55, %v1694_v3 }
 0x20a   : > { %v1474_v18 = vpop.f32.mrb[20].mxu0  ;;  %v1741_v2 = vpop.f32.mrb[85].mxu1 }
 0x20b   : > { %v2861_v29 = vadd.f32 %v1474_v18, %v1025_v8  ;;  %v1476_v42 = vpop.f32.mrb[21].mxu0 }
 0x20d   : > { %v4339_v11 = vpop.f32.mrb[86].mxu1  ;;  %v4341_v51 = vadd.f32 %v2861_v29, %v1699_v31 }
 0x20e   : > { %v1479_v52 = vpop.f32.mrb[22].mxu0  ;;  %v1746_v46 = vpop.f32.mrb[87].mxu1 }
 0x20f   : > { %v2864_v7 = vadd.f32 %v1479_v52, %v1030_v22  ;;  %v1481_v1 = vpop.f32.mrb[23].mxu0 }
 0x211   : > { %v4345_v3 = vpop.f32.mrb[88].mxu1  ;;  %v4347_v25 = vadd.f32 %v2864_v7, %v1704_v33 }
 0x212   : > { %v1484_v35 = vpop.f32.mrb[24].mxu0  ;;  %v1751_v44 = vpop.f32.mrb[89].mxu1 }
 0x213   : > { %v2867_v59 = vadd.f32 %v1484_v35, %v1035_v40  ;;  %v1486_v0 = vpop.f32.mrb[25].mxu0 }
 0x215   : > { %v4351_v31 = vpop.f32.mrb[90].mxu1  ;;  %v4353_v27 = vadd.f32 %v2867_v59, %v1709_v50 }
 0x216   : > { %v1489_v37 = vpop.f32.mrb[26].mxu0  ;;  %v1756_v55 = vpop.f32.mrb[91].mxu1 }
 0x217   : > { %v2870_v20 = vadd.f32 %v1489_v37, %v1040_v17  ;;  %v1491_v8 = vpop.f32.mrb[27].mxu0 }
 0x219   : > { %v4357_v33 = vpop.f32.mrb[92].mxu1  ;;  %v4359_v18 = vadd.f32 %v2870_v20, %v1714_v56 }
 0x21a   : > { %v1494_v2 = vpop.f32.mrb[28].mxu0  ;;  %v1761_v29 = vpop.f32.mrb[93].mxu1 }
 0x21b   : > { %v2873_v42 = vadd.f32 %v1494_v2, %v1045_v5  ;;  %v1496_v22 = vpop.f32.mrb[29].mxu0 }
 0x21d   : > { %v4363_v50 = vpop.f32.mrb[94].mxu1  ;;  %v4365_v52 = vadd.f32 %v2873_v42, %v1719_v62 }
 0x21e   : > { %v1499_v46 = vpop.f32.mrb[30].mxu0  ;;  %v1766_v7 = vpop.f32.mrb[95].mxu1 }
 0x21f   : > { %v2876_v1 = vadd.f32 %v1499_v46, %v1050_v48  ;;  %v1501_v40 = vpop.f32.mrb[31].mxu0 }
 0x221   : > { %v4369_v56 = vpop.f32.mrb[96].mxu1  ;;  %v4371_v35 = vadd.f32 %v2876_v1, %v1724_v57  ;;  %v1065_v57 = vadd.f32 %v4319_v15, %v4287_v24 }
 0x222   : > { %v1504_v44 = vpop.f32.mrb[32].mxu0  ;;  %v1771_v59 = vpop.f32.mrb[97].mxu1 }
 0x223   : > { %v2879_v0 = vadd.f32 %v1504_v44, %v1055_v54  ;;  %v1506_v17 = vpop.f32.mrb[33].mxu0 }
 0x225   : > { %v4375_v62 = vpop.f32.mrb[98].mxu1  ;;  %v4378_v37 = vadd.f32 %v2879_v0, %v4323_v10  ;;  %v1070_v10 = vadd.f32 %v4319_v15, %v4289_v19 }
 0x226   : > { %v1509_v55 = vpop.f32.mrb[34].mxu0  ;;  %v1776_v20 = vpop.f32.mrb[99].mxu1 }
 0x227   : > { %v2882_v8 = vadd.f32 %v1509_v55, %v1060_v39  ;;  %v1511_v43 = vpop.f32.mrb[35].mxu0 }
 0x229   : > { %v4382_v5 = vpop.f32.mrb[100].mxu1  ;;  %v4385_v2 = vadd.f32 %v2882_v8, %v4327_v12  ;;  %v1075_v12 = vadd.f32 %v4319_v15, %v4291_v34 }
 0x22a   : > { %v1514_v29 = vpop.f32.mrb[36].mxu0  ;;  %v1781_v42 = vpop.f32.mrb[101].mxu1 }
 0x22b   : > { %v2885_v63 = vadd.f32 %v1514_v29, %v1065_v57  ;;  %v1516_v22 = vpop.f32.mrb[37].mxu0 }
 0x22d   : > { %v4389_v48 = vpop.f32.mrb[102].mxu1  ;;  %v4392_v46 = vadd.f32 %v2885_v63, %v4333_v47  ;;  %v1080_v47 = vadd.f32 %v4319_v15, %v4293_v38 }
 0x22e   : > { %v1519_v7 = vpop.f32.mrb[38].mxu0  ;;  %v1786_v1 = vpop.f32.mrb[103].mxu1 }
 0x22f   : > { %v2888_v24 = vadd.f32 %v1519_v7, %v1070_v10  ;;  %v1521_v40 = vpop.f32.mrb[39].mxu0 }
 0x231   : > { %v4396_v54 = vpop.f32.mrb[104].mxu1  ;;  %v4399_v44 = vadd.f32 %v2888_v24, %v4339_v11  ;;  %v1085_v11 = vadd.f32 %v4319_v15, %v4295_v49 }
 0x232   : > { %v1524_v59 = vpop.f32.mrb[40].mxu0  ;;  %v1791_v0 = vpop.f32.mrb[105].mxu1 }
 0x233   : > { %v2891_v19 = vadd.f32 %v1524_v59, %v1075_v12  ;;  %v1526_v17 = vpop.f32.mrb[41].mxu0 }
 0x235   : > { %v4403_v39 = vpop.f32.mrb[106].mxu1  ;;  %v4406_v55 = vadd.f32 %v2891_v19, %v4345_v3  ;;  %v1090_v3 = vadd.f32 %v4319_v15, %v4297_v60 }
 0x236   : > { %v1529_v20 = vpop.f32.mrb[42].mxu0  ;;  %v1796_v8 = vpop.f32.mrb[107].mxu1 }
 0x237   : > { %v2894_v34 = vadd.f32 %v1529_v20, %v1080_v47  ;;  %v1531_v43 = vpop.f32.mrb[43].mxu0 }
 0x239   : > { %v4410_v57 = vpop.f32.mrb[108].mxu1  ;;  %v4413_v29 = vadd.f32 %v2894_v34, %v4351_v31  ;;  %v1095_v31 = vadd.f32 %v4319_v15, %v4299_v9 }
 0x23a   : > { %v1534_v42 = vpop.f32.mrb[44].mxu0  ;;  %v1801_v63 = vpop.f32.mrb[109].mxu1 }
 0x23b   : > { %v2897_v38 = vadd.f32 %v1534_v42, %v1085_v11  ;;  %v1536_v22 = vpop.f32.mrb[45].mxu0 }
 0x23c   : > { %v1110_v22 = vadd.f32 %v4319_v15, %v4305_v36 }
 0x23d   : > { %v4417_v10 = vpop.f32.mrb[110].mxu1  ;;  %v4420_v7 = vadd.f32 %v2897_v38, %v4357_v33  ;;  %v1100_v33 = vadd.f32 %v4319_v15, %v4301_v13 }
 0x23e   : > { %v1539_v1 = vpop.f32.mrb[46].mxu0  ;;  %v1806_v24 = vpop.f32.mrb[111].mxu1 }
 0x23f   : > { %v2900_v49 = vadd.f32 %v1539_v1, %v1090_v3  ;;  %v1541_v40 = vpop.f32.mrb[47].mxu0 }
 0x240   : > { %v1115_v40 = vadd.f32 %v4319_v15, %v4307_v53 }
 0x241   : > { %v4424_v12 = vpop.f32.mrb[112].mxu1  ;;  %v4427_v59 = vadd.f32 %v2900_v49, %v4363_v50  ;;  %v1105_v50 = vadd.f32 %v4319_v15, %v4303_v26 }
 0x242   : > { %v1544_v0 = vpop.f32.mrb[48].mxu0  ;;  %v4429_v19 = vpop.f32.mrb[113].mxu1 }
 0x243   : > { %v2903_v60 = vadd.f32 %v1544_v0, %v1095_v31  ;;  %v1546_v17 = vpop.f32.mrb[49].mxu0 }
 0x245   : > { %v4433_v47 = vpop.f32.mrb[114].mxu1  ;;  %v4436_v20 = vadd.f32 %v2903_v60, %v4369_v56 }
 0x246   : > { %v1549_v8 = vpop.f32.mrb[50].mxu0  ;;  %v4438_v9 = vpop.f32.mrb[115].mxu1 }
 0x247   : > { %v2906_v34 = vadd.f32 %v1549_v8, %v1100_v33  ;;  %v1551_v43 = vpop.f32.mrb[51].mxu0 }
 0x248   : > { %v1120_v43 = vadd.f32 %v4319_v15, %v4309_v61 }
 0x249   : > { %v4442_v11 = vpop.f32.mrb[116].mxu1  ;;  %v4445_v42 = vadd.f32 %v2906_v34, %v4375_v62 }
 0x24a   : > { %v1554_v13 = vpop.f32.mrb[52].mxu0  ;;  %v4447_v63 = vpop.f32.mrb[117].mxu1 }
 0x24b   : > { %v2909_v38 = vadd.f32 %v1554_v13, %v1105_v50  ;;  %v1556_v56 = vpop.f32.mrb[53].mxu0 }
 0x24d   : > { %v4451_v3 = vpop.f32.mrb[118].mxu1  ;;  %v4454_v1 = vadd.f32 %v2909_v38, %v4382_v5 }
 0x24e   : > { %v1559_v26 = vpop.f32.mrb[54].mxu0  ;;  %v4456_v24 = vpop.f32.mrb[119].mxu1 }
 0x24f   : > { %v2912_v49 = vadd.f32 %v1559_v26, %v1110_v22  ;;  %v1561_v62 = vpop.f32.mrb[55].mxu0 }
 0x251   : > { %v2548_v31 = vpop.f32.mrb[120].mxu1  ;;  %v4461_v0 = vadd.f32 %v2912_v49, %v4389_v48 }
 0x252   : > { %v1564_v60 = vpop.f32.mrb[56].mxu0  ;;  %v1920_v36 = vadd.f32 %v4335_v23, %v2548_v31  ;;  %v1914_v17 = vpop.f32.mrb[121].mxu1 }
 0x253   : > { %v2915_v33 = vadd.f32 %v1564_v60, %v1115_v40  ;;  %v1566_v5 = vpop.f32.mrb[57].mxu0  ;;  %v1915_v8 = vadd.f32 %v4329_v21, %v1914_v17  ;;  %v1125_v21 = vadd.f32 %v4319_v15, %v4311_v58 }
 0x254   : > { %v2042_v34 = vmax.f32 %v1920_v36, 0.98 }
 0x255   : > { %v2041_v50 = vmax.f32 %v1915_v8, 0.98  ;;  %v2551_v13 = vpop.f32.mrb[122].mxu1  ;;  %v4469_v53 = vadd.f32 %v2915_v33, %v4396_v54 }
 0x256   : > { %v2074_v48 = vmin.f32 %v2042_v34, 0.02  ;;  %v1569_v38 = vpop.f32.mrb[58].mxu0  ;;  %v1930_v56 = vadd.f32 %v4347_v25, %v2551_v13  ;;  %v1924_v22 = vpop.f32.mrb[123].mxu1  ;;  %v1130_v34 = vadd.f32 %v4319_v15, %v4313_v4 }
 0x257   : > { %v2073_v23 = vmin.f32 %v2041_v50, 0.02  ;;  %v2918_v26 = vadd.f32 %v1569_v38, %v1120_v43  ;;  %v1571_v49 = vpop.f32.mrb[59].mxu0  ;;  %v1925_v62 = vadd.f32 %v4341_v51, %v1924_v22 }
 0x258   : > { %2106 = vst [vmem:[%s4473_s20 + $0x48] sm:$0xff] %v2074_v48  ;;  %v2044_v61 = vmax.f32 %v1930_v56, 0.98 }
 0x259   : > { %2105 = vst [vmem:[%s4473_s20 + $0x40] sm:$0xff] %v2073_v23  ;;  %v2043_v54 = vmax.f32 %v1925_v62, 0.98  ;;  %v2554_v25 = vpop.f32.mrb[124].mxu1  ;;  %v4480_v40 = vadd.f32 %v2918_v26, %v4403_v39  ;;  %v975_v26 = vadd.f32 %v4319_v15, %v4172_v14 }
 0x25a   : > { %v2076_v31 = vmin.f32 %v2044_v61, 0.02  ;;  %v1574_v60 = vpop.f32.mrb[60].mxu0  ;;  %v1940_v51 = vadd.f32 %v4359_v18, %v2554_v25  ;;  %v1934_v36 = vpop.f32.mrb[125].mxu1 }
 0x25b   : > { %v2075_v17 = vmin.f32 %v2043_v54, 0.02  ;;  %v2921_v33 = vadd.f32 %v1574_v60, %v1125_v21  ;;  %v1576_v5 = vpop.f32.mrb[61].mxu0  ;;  %v1935_v8 = vadd.f32 %v4353_v27, %v1934_v36 }
 0x25c   : > { %2108 = vst [vmem:[%s4473_s20 + $0x58] sm:$0xff] %v2076_v31  ;;  %v2046_v58 = vmax.f32 %v1940_v51, 0.98  ;;  %v980_v51 = vadd.f32 %v4319_v15, %v4179_v30 }
 0x25d   : > { %2107 = vst [vmem:[%s4473_s20 + $0x50] sm:$0xff] %v2075_v17  ;;  %v2045_v39 = vmax.f32 %v1935_v8, 0.98  ;;  %v2557_v43 = vpop.f32.mrb[126].mxu1  ;;  %v4489_v50 = vadd.f32 %v2921_v33, %v4410_v57 }
 0x25e   : > { %v2078_v18 = vmin.f32 %v2046_v58, 0.02  ;;  %v1579_v13 = vpop.f32.mrb[62].mxu0  ;;  %v1950_v48 = vadd.f32 %v4371_v35, %v2557_v43  ;;  %v1944_v38 = vpop.f32.mrb[127].mxu1 }
 0x25f   : > { %v2077_v56 = vmin.f32 %v2045_v39, 0.02  ;;  %v2924_v27 = vadd.f32 %v1579_v13, %v1130_v34  ;;  %v1581_v22 = vpop.f32.mrb[63].mxu0  ;;  %v1945_v23 = vadd.f32 %v4365_v52, %v1944_v38 }
 0x260   : > { %2110 = vst [vmem:[%s4473_s20 + $0x68] sm:$0xff] %v2078_v18  ;;  %v2048_v4 = vmax.f32 %v1950_v48, 0.98 }
 0x261   : > { %2109 = vst [vmem:[%s4473_s20 + $0x60] sm:$0xff] %v2077_v56  ;;  %v2047_v57 = vmax.f32 %v1945_v23, 0.98  ;;  %v2560_v49 = vpop.f32.mrb[128].mxu1  ;;  %v4498_v62 = vadd.f32 %v2924_v27, %v4417_v10 }
 0x262   : > { %v2080_v35 = vmin.f32 %v2048_v4, 0.02  ;;  %v1649_v61 = vpop.f32.mrb[0].mxu0  ;;  %v1960_v21 = vadd.f32 %v4385_v2, %v2560_v49  ;;  %v1954_v54 = vpop.f32.mrb[129].mxu1 }
 0x263   : > { %v2079_v25 = vmin.f32 %v2047_v57, 0.02  ;;  %v2839_v52 = vadd.f32 %v1649_v61, %v975_v26  ;;  %v1651_v31 = vpop.f32.mrb[1].mxu0  ;;  %v1955_v60 = vadd.f32 %v4378_v37, %v1954_v54 }
 0x264   : > { %2112 = vst [vmem:[%s4473_s20 + $0x78] sm:$0xff] %v2080_v35  ;;  %v2050_v14 = vmax.f32 %v1960_v21, 0.98 }
 0x265   : > { %2111 = vst [vmem:[%s4473_s20 + $0x70] sm:$0xff] %v2079_v25  ;;  %v1875_v10 = vadd.f32 %v2839_v52, %v4429_v19  ;;  %v2049_v36 = vmax.f32 %v1955_v60, 0.98  ;;  %v2563_v17 = vpop.f32.mrb[130].mxu1  ;;  %v985_v19 = vadd.f32 %v4319_v15, %v4185_v41 }
 0x266   : > { %v2082_v33 = vmin.f32 %v2050_v14, 0.02  ;;  %v1654_v2 = vpop.f32.mrb[2].mxu0  ;;  %v1970_v5 = vadd.f32 %v4399_v44, %v2563_v17  ;;  %v1964_v8 = vpop.f32.mrb[131].mxu1 }
 0x267   : > { %v2033_v58 = vmax.f32 %v1875_v10, 0.98  ;;  %v2081_v34 = vmin.f32 %v2049_v36, 0.02  ;;  %v2841_v37 = vadd.f32 %v1654_v2, %v980_v51  ;;  %v1656_v39 = vpop.f32.mrb[3].mxu0  ;;  %v1965_v43 = vadd.f32 %v4392_v46, %v1964_v8 }
 0x268   : > { %2114 = vst [vmem:[%s4473_s20 + $0x88] sm:$0xff] %v2082_v33  ;;  %v2052_v30 = vmax.f32 %v1970_v5, 0.98 }
 0x269   : > { %v2065_v18 = vmin.f32 %v2033_v58, 0.02  ;;  %2113 = vst [vmem:[%s4473_s20 + $0x80] sm:$0xff] %v2081_v34  ;;  %v1880_v13 = vadd.f32 %v2841_v37, %v4424_v12  ;;  %v2051_v48 = vmax.f32 %v1965_v43, 0.98  ;;  %v2566_v44 = vpop.f32.mrb[132].mxu1  ;;  %v990_v12 = vadd.f32 %v4319_v15, %v4191_v32 }
 0x26a   : > { %v2084_v38 = vmin.f32 %v2052_v30, 0.02  ;;  %v1659_v56 = vpop.f32.mrb[4].mxu0  ;;  %v1980_v27 = vadd.f32 %v4413_v29, %v2566_v44  ;;  %v1974_v22 = vpop.f32.mrb[133].mxu1 }
 0x26b   : > { %2097 = vst [vmem:[%s4473_s20] sm:$0xff] %v2065_v18  ;;  %v2034_v46 = vmax.f32 %v1880_v13, 0.98  ;;  %v2083_v23 = vmin.f32 %v2051_v48, 0.02  ;;  %v2843_v4 = vadd.f32 %v1659_v56, %v985_v19  ;;  %v1661_v26 = vpop.f32.mrb[5].mxu0  ;;  %v1975_v41 = vadd.f32 %v4406_v55, %v1974_v22 }
 0x26c   : > { %2116 = vst [vmem:[%s4473_s20 + $0x98] sm:$0xff] %v2084_v38  ;;  %v2054_v57 = vmax.f32 %v1980_v27, 0.98 }
 0x26d   : > { %v2066_v49 = vmin.f32 %v2034_v46, 0.02  ;;  %2115 = vst [vmem:[%s4473_s20 + $0x90] sm:$0xff] %v2083_v23  ;;  %v1885_v35 = vadd.f32 %v2843_v4, %v4438_v9  ;;  %v2053_v29 = vmax.f32 %v1975_v41, 0.98  ;;  %v2569_v61 = vpop.f32.mrb[134].mxu1  ;;  %v995_v9 = vadd.f32 %v4319_v15, %v4197_v6 }
 0x26e   : > { %v2086_v21 = vmin.f32 %v2054_v57, 0.02  ;;  %v1664_v54 = vpop.f32.mrb[6].mxu0  ;;  %v1990_v25 = vadd.f32 %v4427_v59, %v2569_v61  ;;  %v1984_v52 = vpop.f32.mrb[135].mxu1  ;;  %v1010_v61 = vadd.f32 %v4319_v15, %v4215_v45 }
 0x26f   : > { %2098 = vst [vmem:[%s4473_s20 + $0x8] sm:$0xff] %v2066_v49  ;;  %v2035_v55 = vmax.f32 %v1885_v35, 0.98  ;;  %v2085_v31 = vmin.f32 %v2053_v29, 0.02  ;;  %v2845_v60 = vadd.f32 %v1664_v54, %v990_v12  ;;  %v1666_v14 = vpop.f32.mrb[7].mxu0  ;;  %v1985_v32 = vadd.f32 %v4420_v7, %v1984_v52 }
 0x270   : > { %2118 = vst [vmem:[%s4473_s20 + $0xa8] sm:$0xff] %v2086_v21  ;;  %v2056_v51 = vmax.f32 %v1990_v25, 0.98 }
 0x271   : > { %v2067_v10 = vmin.f32 %v2035_v55, 0.02  ;;  %2117 = vst [vmem:[%s4473_s20 + $0xa0] sm:$0xff] %v2085_v31  ;;  %v1890_v36 = vadd.f32 %v2845_v60, %v4433_v47  ;;  %v2055_v59 = vmax.f32 %v1985_v32, 0.98  ;;  %v2572_v17 = vpop.f32.mrb[136].mxu1  ;;  %v1000_v47 = vadd.f32 %v4319_v15, %v4203_v16 }
 0x272   : > { %v2088_v33 = vmin.f32 %v2056_v51, 0.02  ;;  %v1669_v2 = vpop.f32.mrb[8].mxu0  ;;  %v2000_v5 = vadd.f32 %v4445_v42, %v2572_v17  ;;  %v1994_v8 = vpop.f32.mrb[137].mxu1 }
 0x273   : > { %2099 = vst [vmem:[%s4473_s20 + $0x10] sm:$0xff] %v2067_v10  ;;  %v2036_v7 = vmax.f32 %v1890_v36, 0.98  ;;  %v2087_v58 = vmin.f32 %v2055_v59, 0.02  ;;  %v2847_v34 = vadd.f32 %v1669_v2, %v995_v9  ;;  %v1671_v37 = vpop.f32.mrb[9].mxu0  ;;  %v1995_v6 = vadd.f32 %v4436_v20, %v1994_v8 }
 0x274   : > { %2120 = vst [vmem:[%s4473_s20 + $0xb8] sm:$0xff] %v2088_v33  ;;  %v2058_v39 = vmax.f32 %v2000_v5, 0.98 }
 0x275   : > { %v2068_v43 = vmin.f32 %v2036_v7, 0.02  ;;  %2119 = vst [vmem:[%s4473_s20 + $0xb0] sm:$0xff] %v2087_v58  ;;  %v1895_v30 = vadd.f32 %v2847_v34, %v4447_v63  ;;  %v2057_v42 = vmax.f32 %v1995_v6, 0.98  ;;  %v2575_v19 = vpop.f32.mrb[138].mxu1  ;;  %v1005_v63 = vadd.f32 %v4319_v15, %v4209_v28 }
 0x276   : > { %v2090_v18 = vmin.f32 %v2058_v39, 0.02  ;;  %v1674_v13 = vpop.f32.mrb[10].mxu0  ;;  %v2010_v48 = vadd.f32 %v4461_v0, %v2575_v19  ;;  %v2004_v44 = vpop.f32.mrb[139].mxu1 }
 0x277   : > { %2100 = vst [vmem:[%s4473_s20 + $0x18] sm:$0xff] %v2068_v43  ;;  %v2037_v20 = vmax.f32 %v1895_v30, 0.98  ;;  %v2089_v38 = vmin.f32 %v2057_v42, 0.02  ;;  %v2849_v56 = vadd.f32 %v1674_v13, %v1000_v47  ;;  %v1676_v16 = vpop.f32.mrb[11].mxu0  ;;  %v2005_v27 = vadd.f32 %v4454_v1, %v2004_v44 }
 0x278   : > { %2122 = vst [vmem:[%s4473_s20 + $0xc8] sm:$0xff] %v2090_v18  ;;  %v2060_v22 = vmax.f32 %v2010_v48, 0.98 }
 0x279   : > { %v2069_v46 = vmin.f32 %v2037_v20, 0.02  ;;  %2121 = vst [vmem:[%s4473_s20 + $0xc0] sm:$0xff] %v2089_v38  ;;  %v1900_v0 = vadd.f32 %v2849_v56, %v4442_v11  ;;  %v2059_v23 = vmax.f32 %v2005_v27, 0.98  ;;  %v2578_v4 = vpop.f32.mrb[140].mxu1 }
 0x27a   : > { %v2092_v26 = vmin.f32 %v2060_v22, 0.02  ;;  %v1679_v41 = vpop.f32.mrb[12].mxu0  ;;  %v2020_v57 = vadd.f32 %v4480_v40, %v2578_v4  ;;  %v2014_v12 = vpop.f32.mrb[141].mxu1 }
 0x27b   : > { %2101 = vst [vmem:[%s4473_s20 + $0x20] sm:$0xff] %v2069_v46  ;;  %v2038_v1 = vmax.f32 %v1900_v0, 0.98  ;;  %v2091_v49 = vmin.f32 %v2059_v23, 0.02  ;;  %v2851_v35 = vadd.f32 %v1679_v41, %v1005_v63  ;;  %v1681_v28 = vpop.f32.mrb[13].mxu0  ;;  %v2015_v29 = vadd.f32 %v4469_v53, %v2014_v12 }
 0x27c   : > { %2124 = vst [vmem:[%s4473_s20 + $0xd8] sm:$0xff] %v2092_v26  ;;  %v2062_v11 = vmax.f32 %v2020_v57, 0.98 }
 0x27d   : > { %v2070_v21 = vmin.f32 %v2038_v1, 0.02  ;;  %2123 = vst [vmem:[%s4473_s20 + $0xd0] sm:$0xff] %v2091_v49  ;;  %v1905_v40 = vadd.f32 %v2851_v35, %v4456_v24  ;;  %v2061_v54 = vmax.f32 %v2015_v29, 0.98  ;;  %v2581_v25 = vpop.f32.mrb[142].mxu1 }
 0x27e   : > { %v2094_v52 = vmin.f32 %v2062_v11, 0.02  ;;  %v1684_v55 = vpop.f32.mrb[14].mxu0  ;;  %v2030_v31 = vadd.f32 %v4498_v62, %v2581_v25  ;;  %v2024_v53 = vpop.f32.mrb[143].mxu1 }
 0x27f   : > { %2102 = vst [vmem:[%s4473_s20 + $0x28] sm:$0xff] %v2070_v21  ;;  %v2039_v60 = vmax.f32 %v1905_v40, 0.98  ;;  %v2093_v14 = vmin.f32 %v2061_v54, 0.02  ;;  %v2853_v45 = vadd.f32 %v1684_v55, %v1010_v61  ;;  %v1686_v15 = vpop.f32.mrb[15].mxu0  ;;  %v2025_v32 = vadd.f32 %v4489_v50, %v2024_v53 }
 0x280   : > { %2126 = vst [vmem:[%s4473_s20 + $0xe8] sm:$0xff] %v2094_v52  ;;  %v2064_v24 = vmax.f32 %v2030_v31, 0.98 }
 0x281   : > { %v2071_v51 = vmin.f32 %v2039_v60, 0.02  ;;  %2125 = vst [vmem:[%s4473_s20 + $0xe0] sm:$0xff] %v2093_v14  ;;  %v1910_v62 = vadd.f32 %v2853_v45, %v4451_v3  ;;  %v2063_v9 = vmax.f32 %v2025_v32, 0.98 }
 0x282   : > { %v2096_v10 = vmin.f32 %v2064_v24, 0.02 }
 0x283   : > { %2103 = vst [vmem:[%s4473_s20 + $0x30] sm:$0xff] %v2071_v51  ;;  %v2040_v36 = vmax.f32 %v1910_v62, 0.98  ;;  %v2095_v59 = vmin.f32 %v2063_v9, 0.02 }
 0x284   : > { %2128 = vst [vmem:[%s4473_s20 + $0xf8] sm:$0xff] %v2096_v10 }
 0x285   : > { %v2072_v50 = vmin.f32 %v2040_v36, 0.02  ;;  %2127 = vst [vmem:[%s4473_s20 + $0xf0] sm:$0xff] %v2095_v59 }
 0x287   : > { %2104 = vst [vmem:[%s4473_s20 + $0x38] sm:$0xff] %v2072_v50 }
 0x288   : > { %3098 = shalt.err (!%p3095_p10)
}
 0x289   : > { %s3099_s10 = scalar_lea.hbm %s4567_s30, 4096  ;;  %s3103_s21 = scalar_lea.hbm %s4629_s3, 16384 }
 0x28a   : > { %p3100_p11 = scmp.ne.s32.totalorder %s4567_s30, %s3099_s10  ;;  %p3104_p0 = scmp.lt.u32.totalorder %s4567_s30, %s4629_s3 }
 0x28b   : > { %p3105_p1 = scmp.lt.u32.totalorder %s3103_s21, %s3099_s10  ;;  %p3107_p3 = scmp.lt.u32.totalorder %s3099_s10, %s4567_s30 }
 0x28c   : > { %p3101_p12 = pnand %p3100_p11, %p3266_p8 }
 0x28d   : > { %p3106_p2 = por %p3105_p1, %p3104_p0 }
 0x28e   : > { %p3102_p13 = pneg %p3101_p12 }
 0x28f   : > { %p3108_p4 = por %p3107_p3, %p3106_p2 }
 0x291   : > { %p3109_p5 = pnand %p3108_p4, %p3102_p13 }
 0x293   : > { %3112 = shalt.err (!%p3109_p5)
}
 0x294   : > { %s3183_s28 = smov 128   ;;  %s3184_s29 = smov 256  }
 0x295   : > { %s3185_s6 = smov 8  }
 0x296   : > { %3010 = dma.vmem_to_hbm [thread:$0]  (%p3266_p8), %s4570_s25, 4096, %s4567_s30, %s2130_s5, %s3183_s28, %s3184_s29, %s3185_s6  }
 0x297 PF: > { %p3016_p6 = scmp.ge.s32.totalorder %s3179_s19, 2  ;;  %s2159_s7 = sand.u32 1, %s3151_s12  }
 0x298   : > { %s2160_s8 = scalar_lea.sflag [#allocation4], %s2159_s7 }
 0x299   : > { %p3013_p7 = pnand %p3016_p6, %p3270_p9 }
 0x29b   : > { %3146 = dma.done.wait (!%p3013_p7), %s2160_s8, 4096  }
 0x29c   : > { %3148 = vsyncadd (!%p3013_p7), %s2160_s8, 4294963200  ;;  %s16_s19 = sadd.s32 1, %s3179_s19   ;;  %s4778_s12 = smov %s3155_s13 }
 0x29d   : > { %p13_p10 = scmp.ge.s32.totalorder %s16_s19, 6   ;;  %s4779_s13 = smov %s3159_s14 }
 0x29e   : > { %s4780_s14 = smov %s3278_s4  ;;  %s4781_s15 = smov %s3171_s17 }
 0x29f   : > { %s4782_s16 = smov %s3175_s18  ;;  %s4783_s17 = smov %s4786_s22 }
 0x2a0   : > { %s4784_s18 = smov %s4790_s23  ;;  %15 = sbr.rel (!%p13_p10) target bundleno = 5 (0x5), region = 118 }
 0x2a7   :  { %2165 = vsyncpa [#allocation4], 1 }
 0x2a8   :  { %2167 = vsyncpa [#allocation4 + $0x1], 1 }

</bundles_post_ra>
